<compile_context>
chip_gen: v6e
topology: v6e:2x2x1
jax: 0.10.0
libtpu: 0.0.40
codegen_flags: <defaults>
</compile_context>

<pallas_src>
import jax
import jax.numpy as jnp
from jax import lax
from jax.experimental import pallas as pl
from jax.experimental.pallas import tpu as pltpu

# ----------------------------- constants ------------------------------------
N_NODES = 8
N_EDGES = 2                       # |etypes|
N_HIDDEN = 32                     # n_hidden
IN_FEATS = N_HIDDEN               # g.ndata['feat'] width (== n_hidden)
N_LAYERS = 2                      # DGL_AGCN(n_layers=2) builds n_layers + 1 graph layers
N_GRAPH_LAYERS = N_LAYERS + 1
N_CLASSES = 8
PRETRAINED_VECTOR_SIZE = 64

_H = N_HIDDEN
_N = N_NODES
_E = N_EDGES
MSG_WIDTH = 2 * _E * _H           # 128 : [out_0 | out_1 | in_0 | in_1]
LANES = 128

# ------------------- packed parameter-slab row layout -----------------------
# per-layer block (weight blocks 16-row aligned for bf16 tiling)
L_WMSG = 0                        # (H, 128)   [Wout0^T | Wout1^T | Win0^T | Win1^T]
L_WIH = L_WMSG + _H               # 32   (128, 128) Wih^T, gate lanes padded 96->128
L_WHH = L_WIH + MSG_WIDTH         # 160  (H, 128)   Whh^T, padded 96->128
L_BMSG = L_WHH + _H               # 192  (8, 128) sublane-replicated message bias
L_BIH = L_BMSG + _N               # 200  (8, 128)
L_BHH = L_BIH + _N                # 208
L_GIH = L_BHH + _N                # 216
L_GHH = L_GIH + _N                # 224
LYR_STRIDE = L_GHH + _N + 8       # 240

S_MMEAN = N_GRAPH_LAYERS * LYR_STRIDE   # 720  (128,128) segment-mean projection
S_MVAR = S_MMEAN + LANES                # 848  (128,128) segment-var  projection
S_MASK = S_MVAR + LANES                 # 976  (4N,128) block-diag aggregation mask
S_VPAD = S_MASK + 2 * _E * _N           # 1008 (8,128)  1.0 in padded gate lanes

HD_WEMB = S_VPAD + _N + 8               # 1024 (PV, 128)   W_emb^T
HD_WFC1 = HD_WEMB + PRETRAINED_VECTOR_SIZE  # 1088 (2H, 128) W_fc1^T
HD_WATTN = HD_WFC1 + 2 * _H             # 1152 (2H, 128)   W_attn^T (only lane 0 real)
HD_WFC2 = HD_WATTN + 2 * _H             # 1216 (H, 128)    W_fc2^T
HD_WFC3 = HD_WFC2 + _H                  # 1248 (H, 128)    W_fc3^T (lanes >= NC zero)
HD_B = HD_WFC3 + _H                     # 1280 rows: b_emb, b_fc1, b_fc2, b_fc3, b_attn
SLAB_ROWS = HD_B + 16                   # 1296


# ------------------------------- kernel -------------------------------------
def dgl_agcn_kernel(a_ref, feat_ref, goals_ref, slab_ref, out_ref):
    H, N = N_HIDDEN, N_NODES
    f32, bf16 = jnp.float32, jnp.bfloat16

    def mm(a, b):
        return jnp.dot(a, b, preferred_element_type=f32)

    # ---- one-time loads (hoisted out of the layer loop) ----
    a_wide = a_ref[...]                                         # (N, 4N) bf16 [A0|A1|A0^T|A1^T]
    m_mean = slab_ref[S_MMEAN:S_MMEAN + LANES, :]               # (128,128) bf16
    m_var = slab_ref[S_MVAR:S_MVAR + LANES, :]                  # (128,128) bf16
    agg_mask = slab_ref[S_MASK:S_MASK + 2 * _E * N, :].astype(f32)   # (4N,128)
    vpad = slab_ref[S_VPAD:S_VPAD + N, :].astype(f32)           # (N,128) 1.0 in pad lanes

    def seg_layer_norm(x, g, b):
        # Segment LayerNorm ([r|z] over 2H lanes, [n] over H lanes, unbiased, eps=0).
        # Cross-lane mean/var reductions are matmuls on the (idle) MXU.
        mean = mm(x.astype(bf16), m_mean)                       # (N,128) f32
        d = x - mean
        var = mm((d * d).astype(bf16), m_var) + vpad            # vpad keeps pad lanes finite
        return d * (g * lax.rsqrt(var)) + b                     # rsqrt -> EUP

    h = feat_ref[...]                                           # (N, H) f32

    # -------- n_layers+1 gated graph layers --------
    for l in range(N_GRAPH_LAYERS):
        base = l * LYR_STRIDE
        w_msg = slab_ref[base + L_WMSG:base + L_WMSG + H, :]            # (H,128) bf16
        w_ih = slab_ref[base + L_WIH:base + L_WIH + MSG_WIDTH, :]       # (128,128) bf16
        w_hh = slab_ref[base + L_WHH:base + L_WHH + H, :]               # (H,128) bf16
        b_msg = slab_ref[base + L_BMSG:base + L_BMSG + N, :].astype(f32)
        b_ih = slab_ref[base + L_BIH:base + L_BIH + N, :].astype(f32)
        b_hh = slab_ref[base + L_BHH:base + L_BHH + N, :].astype(f32)
        g_ih = slab_ref[base + L_GIH:base + L_GIH + N, :].astype(f32)
        g_hh = slab_ref[base + L_GHH:base + L_GHH + N, :].astype(f32)

        h_bf = h.astype(bf16)

        # (a) all 2E per-edge-type message projections in ONE (N,H)@(H,4EH) matmul
        m_h = jnp.tanh(mm(h_bf, w_msg) + b_msg)                 # (N,128) f32

        # (b) per-edge aggregation as ONE (N,4N)@(4N,128) matmul: the RHS is the
        #     projected messages tiled down the sublanes and masked block-diagonal.
        rhs = (jnp.concatenate([m_h] * (2 * _E), axis=0) * agg_mask).astype(bf16)
        msg = mm(a_wide, rhs)                                   # (N,128) f32

        # (c) LayerNorm-GRU node update (gi / gh are full 128-lane unmasked vregs)
        gi = mm(msg.astype(bf16), w_ih)                         # (N,128)
        gh = mm(h_bf, w_hh)                                     # (N,128)
        ih = seg_layer_norm(gi, g_ih, b_ih)
        hh = seg_layer_norm(gh, g_hh, b_hh)

        rz = jax.nn.sigmoid(ih[:, :2 * H] + hh[:, :2 * H])
        r = rz[:, :H]
        z = rz[:, H:]
        n = jnp.tanh(ih[:, 2 * H:3 * H] + r * hh[:, 2 * H:3 * H])
        h = (1.0 - z) * n + z * h

    # -------- attention readout + goal embedding + MLP decoder --------
    w_emb = slab_ref[HD_WEMB:HD_WEMB + PRETRAINED_VECTOR_SIZE, :]       # (64,128)
    w_fc1 = slab_ref[HD_WFC1:HD_WFC1 + 2 * H, :]                        # (64,128)
    w_attn = slab_ref[HD_WATTN:HD_WATTN + 2 * H, :]                     # (64,128)
    w_fc2 = slab_ref[HD_WFC2:HD_WFC2 + H, :]                            # (32,128)
    w_fc3 = slab_ref[HD_WFC3:HD_WFC3 + H, :]                            # (32,128)
    b_emb = slab_ref[HD_B + 0:HD_B + 1, :].astype(f32)
    b_fc1 = slab_ref[HD_B + 1:HD_B + 2, :].astype(f32)
    b_fc2 = slab_ref[HD_B + 2:HD_B + 3, :].astype(f32)
    b_fc3 = slab_ref[HD_B + 3:HD_B + 4, :].astype(f32)
    b_attn = slab_ref[HD_B + 4:HD_B + 5, :].astype(f32)

    h_bf = h.astype(bf16)

    # embed(goalVec) / embed(goalObjectsVec) share weights -> one (2,PV)@(PV,128) matmul
    goal_e = jnp.tanh(mm(goals_ref[...].astype(bf16), w_emb) + b_emb)   # (2,128)
    goal_embed = goal_e[0:1, :H]
    goal_obj = goal_e[1:2, :H]

    # attention over nodes: cat([h, goal_obj.repeat(N)]) folded into a weight split
    logits = (mm(h_bf, w_attn[:H, :]) + mm(goal_obj.astype(bf16), w_attn[H:, :])
              + b_attn)[:, 0:1]                                         # (N,1)
    logits = logits - jnp.max(logits, axis=0, keepdims=True)
    ew = jnp.exp(logits)
    attn = ew * pl.reciprocal(jnp.sum(ew, axis=0, keepdims=True), approx=True)

    scene = jnp.sum(attn * h, axis=0, keepdims=True)                    # (1,H) == attn^T @ h

    # fc1 on cat([scene, goal_embed]) via weight split; then fc2, fc3 + sigmoid
    z1 = jnp.tanh(mm(scene.astype(bf16), w_fc1[:H, :])
                  + mm(goal_embed.astype(bf16), w_fc1[H:, :]) + b_fc1)  # (1,128)
    z2 = jnp.tanh(mm(z1[:, :H].astype(bf16), w_fc2) + b_fc2)            # (1,128)
    out_ref[...] = jax.nn.sigmoid(mm(z2[:, :H].astype(bf16), w_fc3) + b_fc3)[:, :N_CLASSES]


# ------------------------------ wrapper --------------------------------------
def dgl_agcn_pallas(slab, a_wide, node_feats, goals):
    """slab built ONCE by pack_params (hoisted); a_wide = [A0|A1|A0^T|A1^T] (N,4N)."""
    args = (a_wide.astype(jnp.bfloat16),         # 0/1 adjacency -> exact in bf16
            node_feats.astype(jnp.float32),
            goals.astype(jnp.float32),
            slab)
    vmem = lambda: pl.BlockSpec(memory_space=pltpu.MemorySpace.VMEM)
    out = pl.pallas_call(
        dgl_agcn_kernel,
        out_shape=jax.ShapeDtypeStruct((1, N_CLASSES), jnp.float32),
        in_specs=[vmem() for _ in args],
        out_specs=vmem(),
    )(*args)
    return out.reshape(-1)


# --------------------------- parameter packing --------------------------------
def pack_params(params):
    """Host-side, one-time packing of all weights into ONE lane-dense bf16 slab."""
    H, E, N = N_HIDDEN, N_EDGES, N_NODES
    f32 = jnp.float32

    def pad_lanes(x):
        return jnp.pad(x.astype(f32), ((0, 0), (0, LANES - x.shape[1])))

    def brows(v, rows=N):   # sublane-replicated bias/gain rows (rows, 128)
        row = jnp.zeros((LANES,), f32).at[:v.shape[0]].set(v.astype(f32))
        return jnp.tile(row[None, :], (rows, 1))

    def bias_row(v):
        return jnp.zeros((1, LANES), f32).at[0, :v.shape[0]].set(v.astype(f32))

    blocks = []
    # -- per-layer blocks --
    for lp in params["layers"]:
        w_msg = jnp.concatenate([lp["Wout"][j].T for j in range(E)]
                                + [lp["Win"][j].T for j in range(E)], axis=1)   # (H,128)
        b_msg = jnp.concatenate([lp["bout"][j] for j in range(E)]
                                + [lp["bin"][j] for j in range(E)])             # (128,)
        blocks += [w_msg.astype(f32),            # 32 rows
                   pad_lanes(lp["Wih"].T),       # 128 rows (96 -> 128 lanes)
                   pad_lanes(lp["Whh"].T),       # 32 rows
                   brows(b_msg), brows(lp["bih"]), brows(lp["bhh"]),
                   brows(lp["gih"]), brows(lp["ghh"]),
                   jnp.zeros((8, LANES), f32)]   # pad -> 240 rows / layer

    # -- shared LayerNorm segment-projection matrices, aggregation mask, pad row --
    lane = jnp.arange(LANES)
    seg = jnp.where(lane < 2 * H, 0, jnp.where(lane < 3 * H, 1, 2))
    same = (seg[:, None] == seg[None, :]) & (seg[:, None] < 2)
    mean_val = jnp.where(seg[:, None] == 0, 1.0 / (2 * H), 1.0 / H)
    var_val = jnp.where(seg[:, None] == 0, 1.0 / (2 * H - 1), 1.0 / (H - 1))
    m_mean = jnp.where(same, mean_val, 0.0).astype(f32)                 # (128,128)
    m_var = jnp.where(same, var_val, 0.0).astype(f32)                   # (128,128)
    ri = jnp.arange(2 * E * N)[:, None] // N
    ci = jnp.arange(LANES)[None, :] // H
    agg_mask = (ri == ci).astype(f32)                                   # (4N,128)
    vpad = jnp.tile(jnp.where(lane >= 3 * H, 1.0, 0.0)[None, :], (N, 1)).astype(f32)
    blocks += [m_mean, m_var, agg_mask, vpad, jnp.zeros((8, LANES), f32)]

    # -- head --
    w_attn_pad = jnp.zeros((2 * H, H), f32).at[:, 0].set(params["W_attn"][0])
    w_fc3_pad = jnp.zeros((H, H), f32).at[:, :N_CLASSES].set(params["W_fc3"].T)
    blocks += [pad_lanes(params["W_emb"].T),     # 64 rows
               pad_lanes(params["W_fc1"].T),     # 64
               pad_lanes(w_attn_pad),            # 64
               pad_lanes(params["W_fc2"].T),     # 32
               pad_lanes(w_fc3_pad),             # 32
               bias_row(params["b_emb"]),
               bias_row(params["b_fc1"]),
               bias_row(params["b_fc2"]),
               bias_row(params["b_fc3"]),
               bias_row(params["b_attn"]),
               jnp.zeros((11, LANES), f32)]

    slab = jnp.concatenate(blocks, axis=0)
    assert slab.shape == (SLAB_ROWS, LANES), slab.shape
    return slab.astype(jnp.bfloat16)


# -------------------------- params & reference -------------------------------
def make_params(key):
    H, E, NC, PV = N_HIDDEN, N_EDGES, N_CLASSES, PRETRAINED_VECTOR_SIZE
    keys = iter(jax.random.split(key, 8 * N_GRAPH_LAYERS + 10))

    def w(shape, scale=0.1):
        return jax.random.normal(next(keys), shape, dtype=jnp.float32) * scale

    layers = []
    for _ in range(N_GRAPH_LAYERS):
        layers.append({
            "Wout": w((E, H, H)), "bout": w((E, H)),
            "Win": w((E, H, H)), "bin": w((E, H)),
            "Wih": w((3 * H, 2 * E * H)), "Whh": w((3 * H, H)),
            "bih": w((3 * H,)), "bhh": w((3 * H,)),
            "gih": jnp.ones((3 * H,), jnp.float32),
            "ghh": jnp.ones((3 * H,), jnp.float32),
        })
    p = {"layers": layers}
    p["W_emb"] = w((H, PV));       p["b_emb"] = w((H,))
    p["W_attn"] = w((1, 2 * H));   p["b_attn"] = w((1,))
    p["W_fc1"] = w((H, 2 * H));    p["b_fc1"] = w((H,))
    p["W_fc2"] = w((H, H));        p["b_fc2"] = w((H,))
    p["W_fc3"] = w((NC, H));       p["b_fc3"] = w((NC,))
    return p


def dgl_agcn_ref(params, adjacency, node_feats, goal_vec, goal_objects_vec):
    """Pure-JAX f32 mirror of the torch forward (sanity check)."""
    H, E = N_HIDDEN, N_EDGES
    h = node_feats
    a_out = adjacency
    a_in = jnp.transpose(adjacency, (0, 2, 1))

    def ln(x, g, b):
        mean = jnp.mean(x, 1, keepdims=True)
        std = jnp.sqrt(jnp.sum((x - mean) ** 2, 1, keepdims=True) / (x.shape[1] - 1))
        return g * (x - mean) / std + b

    for lp in params["layers"]:
        m_out = [a_out[j] @ jnp.tanh(h @ lp["Wout"][j].T + lp["bout"][j]) for j in range(E)]
        m_in = [a_in[j] @ jnp.tanh(h @ lp["Win"][j].T + lp["bin"][j]) for j in range(E)]
        message = jnp.concatenate(m_out + m_in, axis=1)
        gi = message @ lp["Wih"].T
        gh = h @ lp["Whh"].T
        ih_rz = ln(gi[:, :2 * H], lp["gih"][:2 * H], lp["bih"][:2 * H])
        hh_rz = ln(gh[:, :2 * H], lp["ghh"][:2 * H], lp["bhh"][:2 * H])
        ih_n = ln(gi[:, 2 * H:], lp["gih"][2 * H:], lp["bih"][2 * H:])
        hh_n = ln(gh[:, 2 * H:], lp["ghh"][2 * H:], lp["bhh"][2 * H:])
        rz = jax.nn.sigmoid(ih_rz + hh_rz)
        r, z = rz[:, :H], rz[:, H:]
        n = jnp.tanh(ih_n + r * hh_n)
        h = (1.0 - z) * n + z * h

    goal_obj_embed = jnp.tanh(goal_objects_vec @ params["W_emb"].T + params["b_emb"])
    attn_embedding = jnp.concatenate(
        [h, jnp.tile(goal_obj_embed[None, :], (h.shape[0], 1))], axis=1)
    logits = attn_embedding @ params["W_attn"].T + params["b_attn"]
    attn = jax.nn.softmax(logits, axis=0)
    scene = attn.T @ h
    goal_embed = jnp.tanh(goal_vec[None, :] @ params["W_emb"].T + params["b_emb"])
    final = jnp.concatenate([scene, goal_embed], axis=1)
    z1 = jnp.tanh(final @ params["W_fc1"].T + params["b_fc1"])
    z2 = jnp.tanh(z1 @ params["W_fc2"].T + params["b_fc2"])
    out = jax.nn.sigmoid(z2 @ params["W_fc3"].T + params["b_fc3"])
    return out.flatten()


# -------------------------------- main ----------------------------------------
if __name__ == "__main__":
    key = jax.random.PRNGKey(0)
    kp, ka, kf, kg1, kg2 = jax.random.split(key, 5)

    params = make_params(kp)
    adjacency = (jax.random.uniform(ka, (N_EDGES, N_NODES, N_NODES)) < 0.3
                 ).astype(jnp.float32)
    node_feats = jax.random.normal(kf, (N_NODES, IN_FEATS), jnp.float32)
    goal_vec = jax.random.normal(kg1, (PRETRAINED_VECTOR_SIZE,), jnp.float32)
    goal_objects_vec = jax.random.normal(kg2, (PRETRAINED_VECTOR_SIZE,), jnp.float32)

    # one-time (hoisted) packing of all parameters into a single bf16 slab
    slab = pack_params(params)
    # lane-dense adjacency block [A0 | A1 | A0^T | A1^T] : (N, 4N)
    a_in = jnp.transpose(adjacency, (0, 2, 1))
    a_wide = jnp.concatenate([adjacency[j] for j in range(N_EDGES)]
                             + [a_in[j] for j in range(N_EDGES)], axis=1)
    goals = jnp.stack([goal_vec, goal_objects_vec], axis=0)            # (2, PV)

    forward = jax.jit(dgl_agcn_pallas)
    out = jax.block_until_ready(forward(slab, a_wide, node_feats, goals))

    ref = dgl_agcn_ref(params, adjacency, node_feats, goal_vec, goal_objects_vec)
    assert out.shape == (N_CLASSES,)
    max_err = float(jnp.max(jnp.abs(out - ref)))
    assert max_err < 5e-2, f"mismatch vs reference, max abs err = {max_err}"
    print("KERNEL_OK")
</pallas_src>

<mosaic_0001>
module attributes {stable_mosaic.version = 11 : i64} {
  func.func @dgl_agcn_kernel(%arg0: memref<8x32xbf16, #tpu.memory_space<vmem>>, %arg1: memref<8x32xf32, #tpu.memory_space<vmem>>, %arg2: memref<2x64xf32, #tpu.memory_space<vmem>>, %arg3: memref<1296x128xbf16, #tpu.memory_space<vmem>>, %arg4: memref<1x8xf32, #tpu.memory_space<vmem>>) attributes {dimension_semantics = [], scalar_prefetch = 0 : i64, scratch_operands = 0 : i64, tpu.core_type = #tpu.core_type<tc>} {
    %c0 = arith.constant 0 : index
    %c0_0 = arith.constant 0 : index
    %0 = vector.load %arg0[%c0, %c0_0] : memref<8x32xbf16, #tpu.memory_space<vmem>>, vector<8x32xbf16>
    %c720 = arith.constant 720 : index
    %c0_1 = arith.constant 0 : index
    %1 = vector.load %arg3[%c720, %c0_1] : memref<1296x128xbf16, #tpu.memory_space<vmem>>, vector<128x128xbf16>
    %c848 = arith.constant 848 : index
    %c0_2 = arith.constant 0 : index
    %2 = vector.load %arg3[%c848, %c0_2] : memref<1296x128xbf16, #tpu.memory_space<vmem>>, vector<128x128xbf16>
    %c976 = arith.constant 976 : index
    %c0_3 = arith.constant 0 : index
    %3 = vector.load %arg3[%c976, %c0_3] : memref<1296x128xbf16, #tpu.memory_space<vmem>>, vector<32x128xbf16>
    %4 = arith.extf %3 : vector<32x128xbf16> to vector<32x128xf32>
    %c1008 = arith.constant 1008 : index
    %c0_4 = arith.constant 0 : index
    %5 = vector.load %arg3[%c1008, %c0_4] : memref<1296x128xbf16, #tpu.memory_space<vmem>>, vector<8x128xbf16>
    %6 = arith.extf %5 : vector<8x128xbf16> to vector<8x128xf32>
    %c0_5 = arith.constant 0 : index
    %c0_6 = arith.constant 0 : index
    %7 = vector.load %arg1[%c0_5, %c0_6] : memref<8x32xf32, #tpu.memory_space<vmem>>, vector<8x32xf32>
    %c0_7 = arith.constant 0 : index
    %c0_8 = arith.constant 0 : index
    %8 = vector.load %arg3[%c0_7, %c0_8] : memref<1296x128xbf16, #tpu.memory_space<vmem>>, vector<32x128xbf16>
    %c32 = arith.constant 32 : index
    %c0_9 = arith.constant 0 : index
    %9 = vector.load %arg3[%c32, %c0_9] : memref<1296x128xbf16, #tpu.memory_space<vmem>>, vector<128x128xbf16>
    %c160 = arith.constant 160 : index
    %c0_10 = arith.constant 0 : index
    %10 = vector.load %arg3[%c160, %c0_10] : memref<1296x128xbf16, #tpu.memory_space<vmem>>, vector<32x128xbf16>
    %c192 = arith.constant 192 : index
    %c0_11 = arith.constant 0 : index
    %11 = vector.load %arg3[%c192, %c0_11] : memref<1296x128xbf16, #tpu.memory_space<vmem>>, vector<8x128xbf16>
    %12 = arith.extf %11 : vector<8x128xbf16> to vector<8x128xf32>
    %c200 = arith.constant 200 : index
    %c0_12 = arith.constant 0 : index
    %13 = vector.load %arg3[%c200, %c0_12] : memref<1296x128xbf16, #tpu.memory_space<vmem>>, vector<8x128xbf16>
    %14 = arith.extf %13 : vector<8x128xbf16> to vector<8x128xf32>
    %c208 = arith.constant 208 : index
    %c0_13 = arith.constant 0 : index
    %15 = vector.load %arg3[%c208, %c0_13] : memref<1296x128xbf16, #tpu.memory_space<vmem>>, vector<8x128xbf16>
    %16 = arith.extf %15 : vector<8x128xbf16> to vector<8x128xf32>
    %c216 = arith.constant 216 : index
    %c0_14 = arith.constant 0 : index
    %17 = vector.load %arg3[%c216, %c0_14] : memref<1296x128xbf16, #tpu.memory_space<vmem>>, vector<8x128xbf16>
    %18 = arith.extf %17 : vector<8x128xbf16> to vector<8x128xf32>
    %c224 = arith.constant 224 : index
    %c0_15 = arith.constant 0 : index
    %19 = vector.load %arg3[%c224, %c0_15] : memref<1296x128xbf16, #tpu.memory_space<vmem>>, vector<8x128xbf16>
    %20 = arith.extf %19 : vector<8x128xbf16> to vector<8x128xf32>
    %21 = arith.truncf %7 : vector<8x32xf32> to vector<8x32xbf16>
    %cst = arith.constant dense<0.000000e+00> : vector<8x128xf32>
    %22 = tpu.matmul %21, %8, %cst {dimension_numbers = #tpu.dot_dimension_numbers<[1], [0], [0], [1], [0, 0, 1, 1], [], []>} : vector<8x32xbf16>, vector<32x128xbf16>, vector<8x128xf32> -> vector<8x128xf32>
    %23 = arith.addf %22, %12 : vector<8x128xf32>
    %24 = math.tanh %23 : vector<8x128xf32>
    %25 = tpu.concatenate %24, %24, %24, %24 in 0 : vector<8x128xf32>, vector<8x128xf32>, vector<8x128xf32>, vector<8x128xf32> -> vector<32x128xf32>
    %26 = arith.mulf %25, %4 : vector<32x128xf32>
    %27 = arith.truncf %26 : vector<32x128xf32> to vector<32x128xbf16>
    %cst_16 = arith.constant dense<0.000000e+00> : vector<8x128xf32>
    %28 = tpu.matmul %0, %27, %cst_16 {dimension_numbers = #tpu.dot_dimension_numbers<[1], [0], [0], [1], [0, 0, 1, 1], [], []>} : vector<8x32xbf16>, vector<32x128xbf16>, vector<8x128xf32> -> vector<8x128xf32>
    %29 = arith.truncf %28 : vector<8x128xf32> to vector<8x128xbf16>
    %cst_17 = arith.constant dense<0.000000e+00> : vector<8x128xf32>
    %30 = tpu.matmul %29, %9, %cst_17 {dimension_numbers = #tpu.dot_dimension_numbers<[1], [0], [0], [1], [0, 0, 1, 1], [], []>} : vector<8x128xbf16>, vector<128x128xbf16>, vector<8x128xf32> -> vector<8x128xf32>
    %cst_18 = arith.constant dense<0.000000e+00> : vector<8x128xf32>
    %31 = tpu.matmul %21, %10, %cst_18 {dimension_numbers = #tpu.dot_dimension_numbers<[1], [0], [0], [1], [0, 0, 1, 1], [], []>} : vector<8x32xbf16>, vector<32x128xbf16>, vector<8x128xf32> -> vector<8x128xf32>
    %32 = arith.truncf %30 : vector<8x128xf32> to vector<8x128xbf16>
    %cst_19 = arith.constant dense<0.000000e+00> : vector<8x128xf32>
    %33 = tpu.matmul %32, %1, %cst_19 {dimension_numbers = #tpu.dot_dimension_numbers<[1], [0], [0], [1], [0, 0, 1, 1], [], []>} : vector<8x128xbf16>, vector<128x128xbf16>, vector<8x128xf32> -> vector<8x128xf32>
    %34 = arith.subf %30, %33 : vector<8x128xf32>
    %35 = arith.mulf %34, %34 : vector<8x128xf32>
    %36 = arith.truncf %35 : vector<8x128xf32> to vector<8x128xbf16>
    %cst_20 = arith.constant dense<0.000000e+00> : vector<8x128xf32>
    %37 = tpu.matmul %36, %2, %cst_20 {dimension_numbers = #tpu.dot_dimension_numbers<[1], [0], [0], [1], [0, 0, 1, 1], [], []>} : vector<8x128xbf16>, vector<128x128xbf16>, vector<8x128xf32> -> vector<8x128xf32>
    %38 = arith.addf %37, %6 : vector<8x128xf32>
    %39 = math.rsqrt %38 : vector<8x128xf32>
    %40 = arith.mulf %18, %39 : vector<8x128xf32>
    %41 = arith.mulf %34, %40 : vector<8x128xf32>
    %42 = arith.addf %41, %14 : vector<8x128xf32>
    %43 = arith.truncf %31 : vector<8x128xf32> to vector<8x128xbf16>
    %cst_21 = arith.constant dense<0.000000e+00> : vector<8x128xf32>
    %44 = tpu.matmul %43, %1, %cst_21 {dimension_numbers = #tpu.dot_dimension_numbers<[1], [0], [0], [1], [0, 0, 1, 1], [], []>} : vector<8x128xbf16>, vector<128x128xbf16>, vector<8x128xf32> -> vector<8x128xf32>
    %45 = arith.subf %31, %44 : vector<8x128xf32>
    %46 = arith.mulf %45, %45 : vector<8x128xf32>
    %47 = arith.truncf %46 : vector<8x128xf32> to vector<8x128xbf16>
    %cst_22 = arith.constant dense<0.000000e+00> : vector<8x128xf32>
    %48 = tpu.matmul %47, %2, %cst_22 {dimension_numbers = #tpu.dot_dimension_numbers<[1], [0], [0], [1], [0, 0, 1, 1], [], []>} : vector<8x128xbf16>, vector<128x128xbf16>, vector<8x128xf32> -> vector<8x128xf32>
    %49 = arith.addf %48, %6 : vector<8x128xf32>
    %50 = math.rsqrt %49 : vector<8x128xf32>
    %51 = arith.mulf %20, %50 : vector<8x128xf32>
    %52 = arith.mulf %45, %51 : vector<8x128xf32>
    %53 = arith.addf %52, %16 : vector<8x128xf32>
    %54 = vector.extract_strided_slice %42 {offsets = [0, 0], sizes = [8, 64], strides = [1, 1]} : vector<8x128xf32> to vector<8x64xf32>
    %55 = vector.extract_strided_slice %53 {offsets = [0, 0], sizes = [8, 64], strides = [1, 1]} : vector<8x128xf32> to vector<8x64xf32>
    %56 = arith.addf %54, %55 : vector<8x64xf32>
    %57 = arith.negf %56 : vector<8x64xf32>
    %58 = math.exp %57 : vector<8x64xf32>
    %cst_23 = arith.constant 1.000000e+00 : f32
    %59 = vector.broadcast %cst_23 : f32 to vector<8x64xf32>
    %60 = arith.addf %59, %58 : vector<8x64xf32>
    %61 = arith.divf %59, %60 : vector<8x64xf32>
    %62 = vector.extract_strided_slice %61 {offsets = [0, 0], sizes = [8, 32], strides = [1, 1]} : vector<8x64xf32> to vector<8x32xf32>
    %63 = vector.extract_strided_slice %61 {offsets = [0, 32], sizes = [8, 32], strides = [1, 1]} : vector<8x64xf32> to vector<8x32xf32>
    %64 = vector.extract_strided_slice %42 {offsets = [0, 64], sizes = [8, 32], strides = [1, 1]} : vector<8x128xf32> to vector<8x32xf32>
    %65 = vector.extract_strided_slice %53 {offsets = [0, 64], sizes = [8, 32], strides = [1, 1]} : vector<8x128xf32> to vector<8x32xf32>
    %66 = arith.mulf %62, %65 : vector<8x32xf32>
    %67 = arith.addf %64, %66 : vector<8x32xf32>
    %68 = math.tanh %67 : vector<8x32xf32>
    %cst_24 = arith.constant 1.000000e+00 : f32
    %69 = vector.broadcast %cst_24 : f32 to vector<8x32xf32>
    %70 = arith.subf %69, %63 : vector<8x32xf32>
    %71 = arith.mulf %70, %68 : vector<8x32xf32>
    %72 = arith.mulf %63, %7 : vector<8x32xf32>
    %73 = arith.addf %71, %72 : vector<8x32xf32>
    %c240 = arith.constant 240 : index
    %c0_25 = arith.constant 0 : index
    %74 = vector.load %arg3[%c240, %c0_25] : memref<1296x128xbf16, #tpu.memory_space<vmem>>, vector<32x128xbf16>
    %c272 = arith.constant 272 : index
    %c0_26 = arith.constant 0 : index
    %75 = vector.load %arg3[%c272, %c0_26] : memref<1296x128xbf16, #tpu.memory_space<vmem>>, vector<128x128xbf16>
    %c400 = arith.constant 400 : index
    %c0_27 = arith.constant 0 : index
    %76 = vector.load %arg3[%c400, %c0_27] : memref<1296x128xbf16, #tpu.memory_space<vmem>>, vector<32x128xbf16>
    %c432 = arith.constant 432 : index
    %c0_28 = arith.constant 0 : index
    %77 = vector.load %arg3[%c432, %c0_28] : memref<1296x128xbf16, #tpu.memory_space<vmem>>, vector<8x128xbf16>
    %78 = arith.extf %77 : vector<8x128xbf16> to vector<8x128xf32>
    %c440 = arith.constant 440 : index
    %c0_29 = arith.constant 0 : index
    %79 = vector.load %arg3[%c440, %c0_29] : memref<1296x128xbf16, #tpu.memory_space<vmem>>, vector<8x128xbf16>
    %80 = arith.extf %79 : vector<8x128xbf16> to vector<8x128xf32>
    %c448 = arith.constant 448 : index
    %c0_30 = arith.constant 0 : index
    %81 = vector.load %arg3[%c448, %c0_30] : memref<1296x128xbf16, #tpu.memory_space<vmem>>, vector<8x128xbf16>
    %82 = arith.extf %81 : vector<8x128xbf16> to vector<8x128xf32>
    %c456 = arith.constant 456 : index
    %c0_31 = arith.constant 0 : index
    %83 = vector.load %arg3[%c456, %c0_31] : memref<1296x128xbf16, #tpu.memory_space<vmem>>, vector<8x128xbf16>
    %84 = arith.extf %83 : vector<8x128xbf16> to vector<8x128xf32>
    %c464 = arith.constant 464 : index
    %c0_32 = arith.constant 0 : index
    %85 = vector.load %arg3[%c464, %c0_32] : memref<1296x128xbf16, #tpu.memory_space<vmem>>, vector<8x128xbf16>
    %86 = arith.extf %85 : vector<8x128xbf16> to vector<8x128xf32>
    %87 = arith.truncf %73 : vector<8x32xf32> to vector<8x32xbf16>
    %cst_33 = arith.constant dense<0.000000e+00> : vector<8x128xf32>
    %88 = tpu.matmul %87, %74, %cst_33 {dimension_numbers = #tpu.dot_dimension_numbers<[1], [0], [0], [1], [0, 0, 1, 1], [], []>} : vector<8x32xbf16>, vector<32x128xbf16>, vector<8x128xf32> -> vector<8x128xf32>
    %89 = arith.addf %88, %78 : vector<8x128xf32>
    %90 = math.tanh %89 : vector<8x128xf32>
    %91 = tpu.concatenate %90, %90, %90, %90 in 0 : vector<8x128xf32>, vector<8x128xf32>, vector<8x128xf32>, vector<8x128xf32> -> vector<32x128xf32>
    %92 = arith.mulf %91, %4 : vector<32x128xf32>
    %93 = arith.truncf %92 : vector<32x128xf32> to vector<32x128xbf16>
    %cst_34 = arith.constant dense<0.000000e+00> : vector<8x128xf32>
    %94 = tpu.matmul %0, %93, %cst_34 {dimension_numbers = #tpu.dot_dimension_numbers<[1], [0], [0], [1], [0, 0, 1, 1], [], []>} : vector<8x32xbf16>, vector<32x128xbf16>, vector<8x128xf32> -> vector<8x128xf32>
    %95 = arith.truncf %94 : vector<8x128xf32> to vector<8x128xbf16>
    %cst_35 = arith.constant dense<0.000000e+00> : vector<8x128xf32>
    %96 = tpu.matmul %95, %75, %cst_35 {dimension_numbers = #tpu.dot_dimension_numbers<[1], [0], [0], [1], [0, 0, 1, 1], [], []>} : vector<8x128xbf16>, vector<128x128xbf16>, vector<8x128xf32> -> vector<8x128xf32>
    %cst_36 = arith.constant dense<0.000000e+00> : vector<8x128xf32>
    %97 = tpu.matmul %87, %76, %cst_36 {dimension_numbers = #tpu.dot_dimension_numbers<[1], [0], [0], [1], [0, 0, 1, 1], [], []>} : vector<8x32xbf16>, vector<32x128xbf16>, vector<8x128xf32> -> vector<8x128xf32>
    %98 = arith.truncf %96 : vector<8x128xf32> to vector<8x128xbf16>
    %cst_37 = arith.constant dense<0.000000e+00> : vector<8x128xf32>
    %99 = tpu.matmul %98, %1, %cst_37 {dimension_numbers = #tpu.dot_dimension_numbers<[1], [0], [0], [1], [0, 0, 1, 1], [], []>} : vector<8x128xbf16>, vector<128x128xbf16>, vector<8x128xf32> -> vector<8x128xf32>
    %100 = arith.subf %96, %99 : vector<8x128xf32>
    %101 = arith.mulf %100, %100 : vector<8x128xf32>
    %102 = arith.truncf %101 : vector<8x128xf32> to vector<8x128xbf16>
    %cst_38 = arith.constant dense<0.000000e+00> : vector<8x128xf32>
    %103 = tpu.matmul %102, %2, %cst_38 {dimension_numbers = #tpu.dot_dimension_numbers<[1], [0], [0], [1], [0, 0, 1, 1], [], []>} : vector<8x128xbf16>, vector<128x128xbf16>, vector<8x128xf32> -> vector<8x128xf32>
    %104 = arith.addf %103, %6 : vector<8x128xf32>
    %105 = math.rsqrt %104 : vector<8x128xf32>
    %106 = arith.mulf %84, %105 : vector<8x128xf32>
    %107 = arith.mulf %100, %106 : vector<8x128xf32>
    %108 = arith.addf %107, %80 : vector<8x128xf32>
    %109 = arith.truncf %97 : vector<8x128xf32> to vector<8x128xbf16>
    %cst_39 = arith.constant dense<0.000000e+00> : vector<8x128xf32>
    %110 = tpu.matmul %109, %1, %cst_39 {dimension_numbers = #tpu.dot_dimension_numbers<[1], [0], [0], [1], [0, 0, 1, 1], [], []>} : vector<8x128xbf16>, vector<128x128xbf16>, vector<8x128xf32> -> vector<8x128xf32>
    %111 = arith.subf %97, %110 : vector<8x128xf32>
    %112 = arith.mulf %111, %111 : vector<8x128xf32>
    %113 = arith.truncf %112 : vector<8x128xf32> to vector<8x128xbf16>
    %cst_40 = arith.constant dense<0.000000e+00> : vector<8x128xf32>
    %114 = tpu.matmul %113, %2, %cst_40 {dimension_numbers = #tpu.dot_dimension_numbers<[1], [0], [0], [1], [0, 0, 1, 1], [], []>} : vector<8x128xbf16>, vector<128x128xbf16>, vector<8x128xf32> -> vector<8x128xf32>
    %115 = arith.addf %114, %6 : vector<8x128xf32>
    %116 = math.rsqrt %115 : vector<8x128xf32>
    %117 = arith.mulf %86, %116 : vector<8x128xf32>
    %118 = arith.mulf %111, %117 : vector<8x128xf32>
    %119 = arith.addf %118, %82 : vector<8x128xf32>
    %120 = vector.extract_strided_slice %108 {offsets = [0, 0], sizes = [8, 64], strides = [1, 1]} : vector<8x128xf32> to vector<8x64xf32>
    %121 = vector.extract_strided_slice %119 {offsets = [0, 0], sizes = [8, 64], strides = [1, 1]} : vector<8x128xf32> to vector<8x64xf32>
    %122 = arith.addf %120, %121 : vector<8x64xf32>
    %123 = arith.negf %122 : vector<8x64xf32>
    %124 = math.exp %123 : vector<8x64xf32>
    %cst_41 = arith.constant 1.000000e+00 : f32
    %125 = vector.broadcast %cst_41 : f32 to vector<8x64xf32>
    %126 = arith.addf %125, %124 : vector<8x64xf32>
    %127 = arith.divf %125, %126 : vector<8x64xf32>
    %128 = vector.extract_strided_slice %127 {offsets = [0, 0], sizes = [8, 32], strides = [1, 1]} : vector<8x64xf32> to vector<8x32xf32>
    %129 = vector.extract_strided_slice %127 {offsets = [0, 32], sizes = [8, 32], strides = [1, 1]} : vector<8x64xf32> to vector<8x32xf32>
    %130 = vector.extract_strided_slice %108 {offsets = [0, 64], sizes = [8, 32], strides = [1, 1]} : vector<8x128xf32> to vector<8x32xf32>
    %131 = vector.extract_strided_slice %119 {offsets = [0, 64], sizes = [8, 32], strides = [1, 1]} : vector<8x128xf32> to vector<8x32xf32>
    %132 = arith.mulf %128, %131 : vector<8x32xf32>
    %133 = arith.addf %130, %132 : vector<8x32xf32>
    %134 = math.tanh %133 : vector<8x32xf32>
    %cst_42 = arith.constant 1.000000e+00 : f32
    %135 = vector.broadcast %cst_42 : f32 to vector<8x32xf32>
    %136 = arith.subf %135, %129 : vector<8x32xf32>
    %137 = arith.mulf %136, %134 : vector<8x32xf32>
    %138 = arith.mulf %129, %73 : vector<8x32xf32>
    %139 = arith.addf %137, %138 : vector<8x32xf32>
    %c480 = arith.constant 480 : index
    %c0_43 = arith.constant 0 : index
    %140 = vector.load %arg3[%c480, %c0_43] : memref<1296x128xbf16, #tpu.memory_space<vmem>>, vector<32x128xbf16>
    %c512 = arith.constant 512 : index
    %c0_44 = arith.constant 0 : index
    %141 = vector.load %arg3[%c512, %c0_44] : memref<1296x128xbf16, #tpu.memory_space<vmem>>, vector<128x128xbf16>
    %c640 = arith.constant 640 : index
    %c0_45 = arith.constant 0 : index
    %142 = vector.load %arg3[%c640, %c0_45] : memref<1296x128xbf16, #tpu.memory_space<vmem>>, vector<32x128xbf16>
    %c672 = arith.constant 672 : index
    %c0_46 = arith.constant 0 : index
    %143 = vector.load %arg3[%c672, %c0_46] : memref<1296x128xbf16, #tpu.memory_space<vmem>>, vector<8x128xbf16>
    %144 = arith.extf %143 : vector<8x128xbf16> to vector<8x128xf32>
    %c680 = arith.constant 680 : index
    %c0_47 = arith.constant 0 : index
    %145 = vector.load %arg3[%c680, %c0_47] : memref<1296x128xbf16, #tpu.memory_space<vmem>>, vector<8x128xbf16>
    %146 = arith.extf %145 : vector<8x128xbf16> to vector<8x128xf32>
    %c688 = arith.constant 688 : index
    %c0_48 = arith.constant 0 : index
    %147 = vector.load %arg3[%c688, %c0_48] : memref<1296x128xbf16, #tpu.memory_space<vmem>>, vector<8x128xbf16>
    %148 = arith.extf %147 : vector<8x128xbf16> to vector<8x128xf32>
    %c696 = arith.constant 696 : index
    %c0_49 = arith.constant 0 : index
    %149 = vector.load %arg3[%c696, %c0_49] : memref<1296x128xbf16, #tpu.memory_space<vmem>>, vector<8x128xbf16>
    %150 = arith.extf %149 : vector<8x128xbf16> to vector<8x128xf32>
    %c704 = arith.constant 704 : index
    %c0_50 = arith.constant 0 : index
    %151 = vector.load %arg3[%c704, %c0_50] : memref<1296x128xbf16, #tpu.memory_space<vmem>>, vector<8x128xbf16>
    %152 = arith.extf %151 : vector<8x128xbf16> to vector<8x128xf32>
    %153 = arith.truncf %139 : vector<8x32xf32> to vector<8x32xbf16>
    %cst_51 = arith.constant dense<0.000000e+00> : vector<8x128xf32>
    %154 = tpu.matmul %153, %140, %cst_51 {dimension_numbers = #tpu.dot_dimension_numbers<[1], [0], [0], [1], [0, 0, 1, 1], [], []>} : vector<8x32xbf16>, vector<32x128xbf16>, vector<8x128xf32> -> vector<8x128xf32>
    %155 = arith.addf %154, %144 : vector<8x128xf32>
    %156 = math.tanh %155 : vector<8x128xf32>
    %157 = tpu.concatenate %156, %156, %156, %156 in 0 : vector<8x128xf32>, vector<8x128xf32>, vector<8x128xf32>, vector<8x128xf32> -> vector<32x128xf32>
    %158 = arith.mulf %157, %4 : vector<32x128xf32>
    %159 = arith.truncf %158 : vector<32x128xf32> to vector<32x128xbf16>
    %cst_52 = arith.constant dense<0.000000e+00> : vector<8x128xf32>
    %160 = tpu.matmul %0, %159, %cst_52 {dimension_numbers = #tpu.dot_dimension_numbers<[1], [0], [0], [1], [0, 0, 1, 1], [], []>} : vector<8x32xbf16>, vector<32x128xbf16>, vector<8x128xf32> -> vector<8x128xf32>
    %161 = arith.truncf %160 : vector<8x128xf32> to vector<8x128xbf16>
    %cst_53 = arith.constant dense<0.000000e+00> : vector<8x128xf32>
    %162 = tpu.matmul %161, %141, %cst_53 {dimension_numbers = #tpu.dot_dimension_numbers<[1], [0], [0], [1], [0, 0, 1, 1], [], []>} : vector<8x128xbf16>, vector<128x128xbf16>, vector<8x128xf32> -> vector<8x128xf32>
    %cst_54 = arith.constant dense<0.000000e+00> : vector<8x128xf32>
    %163 = tpu.matmul %153, %142, %cst_54 {dimension_numbers = #tpu.dot_dimension_numbers<[1], [0], [0], [1], [0, 0, 1, 1], [], []>} : vector<8x32xbf16>, vector<32x128xbf16>, vector<8x128xf32> -> vector<8x128xf32>
    %164 = arith.truncf %162 : vector<8x128xf32> to vector<8x128xbf16>
    %cst_55 = arith.constant dense<0.000000e+00> : vector<8x128xf32>
    %165 = tpu.matmul %164, %1, %cst_55 {dimension_numbers = #tpu.dot_dimension_numbers<[1], [0], [0], [1], [0, 0, 1, 1], [], []>} : vector<8x128xbf16>, vector<128x128xbf16>, vector<8x128xf32> -> vector<8x128xf32>
    %166 = arith.subf %162, %165 : vector<8x128xf32>
    %167 = arith.mulf %166, %166 : vector<8x128xf32>
    %168 = arith.truncf %167 : vector<8x128xf32> to vector<8x128xbf16>
    %cst_56 = arith.constant dense<0.000000e+00> : vector<8x128xf32>
    %169 = tpu.matmul %168, %2, %cst_56 {dimension_numbers = #tpu.dot_dimension_numbers<[1], [0], [0], [1], [0, 0, 1, 1], [], []>} : vector<8x128xbf16>, vector<128x128xbf16>, vector<8x128xf32> -> vector<8x128xf32>
    %170 = arith.addf %169, %6 : vector<8x128xf32>
    %171 = math.rsqrt %170 : vector<8x128xf32>
    %172 = arith.mulf %150, %171 : vector<8x128xf32>
    %173 = arith.mulf %166, %172 : vector<8x128xf32>
    %174 = arith.addf %173, %146 : vector<8x128xf32>
    %175 = arith.truncf %163 : vector<8x128xf32> to vector<8x128xbf16>
    %cst_57 = arith.constant dense<0.000000e+00> : vector<8x128xf32>
    %176 = tpu.matmul %175, %1, %cst_57 {dimension_numbers = #tpu.dot_dimension_numbers<[1], [0], [0], [1], [0, 0, 1, 1], [], []>} : vector<8x128xbf16>, vector<128x128xbf16>, vector<8x128xf32> -> vector<8x128xf32>
    %177 = arith.subf %163, %176 : vector<8x128xf32>
    %178 = arith.mulf %177, %177 : vector<8x128xf32>
    %179 = arith.truncf %178 : vector<8x128xf32> to vector<8x128xbf16>
    %cst_58 = arith.constant dense<0.000000e+00> : vector<8x128xf32>
    %180 = tpu.matmul %179, %2, %cst_58 {dimension_numbers = #tpu.dot_dimension_numbers<[1], [0], [0], [1], [0, 0, 1, 1], [], []>} : vector<8x128xbf16>, vector<128x128xbf16>, vector<8x128xf32> -> vector<8x128xf32>
    %181 = arith.addf %180, %6 : vector<8x128xf32>
    %182 = math.rsqrt %181 : vector<8x128xf32>
    %183 = arith.mulf %152, %182 : vector<8x128xf32>
    %184 = arith.mulf %177, %183 : vector<8x128xf32>
    %185 = arith.addf %184, %148 : vector<8x128xf32>
    %186 = vector.extract_strided_slice %174 {offsets = [0, 0], sizes = [8, 64], strides = [1, 1]} : vector<8x128xf32> to vector<8x64xf32>
    %187 = vector.extract_strided_slice %185 {offsets = [0, 0], sizes = [8, 64], strides = [1, 1]} : vector<8x128xf32> to vector<8x64xf32>
    %188 = arith.addf %186, %187 : vector<8x64xf32>
    %189 = arith.negf %188 : vector<8x64xf32>
    %190 = math.exp %189 : vector<8x64xf32>
    %cst_59 = arith.constant 1.000000e+00 : f32
    %191 = vector.broadcast %cst_59 : f32 to vector<8x64xf32>
    %192 = arith.addf %191, %190 : vector<8x64xf32>
    %193 = arith.divf %191, %192 : vector<8x64xf32>
    %194 = vector.extract_strided_slice %193 {offsets = [0, 0], sizes = [8, 32], strides = [1, 1]} : vector<8x64xf32> to vector<8x32xf32>
    %195 = vector.extract_strided_slice %193 {offsets = [0, 32], sizes = [8, 32], strides = [1, 1]} : vector<8x64xf32> to vector<8x32xf32>
    %196 = vector.extract_strided_slice %174 {offsets = [0, 64], sizes = [8, 32], strides = [1, 1]} : vector<8x128xf32> to vector<8x32xf32>
    %197 = vector.extract_strided_slice %185 {offsets = [0, 64], sizes = [8, 32], strides = [1, 1]} : vector<8x128xf32> to vector<8x32xf32>
    %198 = arith.mulf %194, %197 : vector<8x32xf32>
    %199 = arith.addf %196, %198 : vector<8x32xf32>
    %200 = math.tanh %199 : vector<8x32xf32>
    %cst_60 = arith.constant 1.000000e+00 : f32
    %201 = vector.broadcast %cst_60 : f32 to vector<8x32xf32>
    %202 = arith.subf %201, %195 : vector<8x32xf32>
    %203 = arith.mulf %202, %200 : vector<8x32xf32>
    %204 = arith.mulf %195, %139 : vector<8x32xf32>
    %205 = arith.addf %203, %204 : vector<8x32xf32>
    %c1024 = arith.constant 1024 : index
    %c0_61 = arith.constant 0 : index
    %206 = vector.load %arg3[%c1024, %c0_61] : memref<1296x128xbf16, #tpu.memory_space<vmem>>, vector<64x128xbf16>
    %c1088 = arith.constant 1088 : index
    %c0_62 = arith.constant 0 : index
    %207 = vector.load %arg3[%c1088, %c0_62] : memref<1296x128xbf16, #tpu.memory_space<vmem>>, vector<64x128xbf16>
    %c1152 = arith.constant 1152 : index
    %c0_63 = arith.constant 0 : index
    %208 = vector.load %arg3[%c1152, %c0_63] : memref<1296x128xbf16, #tpu.memory_space<vmem>>, vector<64x128xbf16>
    %c1216 = arith.constant 1216 : index
    %c0_64 = arith.constant 0 : index
    %209 = vector.load %arg3[%c1216, %c0_64] : memref<1296x128xbf16, #tpu.memory_space<vmem>>, vector<32x128xbf16>
    %c1248 = arith.constant 1248 : index
    %c0_65 = arith.constant 0 : index
    %210 = vector.load %arg3[%c1248, %c0_65] : memref<1296x128xbf16, #tpu.memory_space<vmem>>, vector<32x128xbf16>
    %c1280 = arith.constant 1280 : index
    %c0_66 = arith.constant 0 : index
    %211 = vector.load %arg3[%c1280, %c0_66] : memref<1296x128xbf16, #tpu.memory_space<vmem>>, vector<1x128xbf16>
    %212 = arith.extf %211 : vector<1x128xbf16> to vector<1x128xf32>
    %c1281 = arith.constant 1281 : index
    %c0_67 = arith.constant 0 : index
    %213 = vector.load %arg3[%c1281, %c0_67] : memref<1296x128xbf16, #tpu.memory_space<vmem>>, vector<1x128xbf16>
    %214 = arith.extf %213 : vector<1x128xbf16> to vector<1x128xf32>
    %c1282 = arith.constant 1282 : index
    %c0_68 = arith.constant 0 : index
    %215 = vector.load %arg3[%c1282, %c0_68] : memref<1296x128xbf16, #tpu.memory_space<vmem>>, vector<1x128xbf16>
    %216 = arith.extf %215 : vector<1x128xbf16> to vector<1x128xf32>
    %c1283 = arith.constant 1283 : index
    %c0_69 = arith.constant 0 : index
    %217 = vector.load %arg3[%c1283, %c0_69] : memref<1296x128xbf16, #tpu.memory_space<vmem>>, vector<1x128xbf16>
    %218 = arith.extf %217 : vector<1x128xbf16> to vector<1x128xf32>
    %c1284 = arith.constant 1284 : index
    %c0_70 = arith.constant 0 : index
    %219 = vector.load %arg3[%c1284, %c0_70] : memref<1296x128xbf16, #tpu.memory_space<vmem>>, vector<1x128xbf16>
    %220 = arith.extf %219 : vector<1x128xbf16> to vector<1x128xf32>
    %221 = arith.truncf %205 : vector<8x32xf32> to vector<8x32xbf16>
    %c0_71 = arith.constant 0 : index
    %c0_72 = arith.constant 0 : index
    %222 = vector.load %arg2[%c0_71, %c0_72] : memref<2x64xf32, #tpu.memory_space<vmem>>, vector<2x64xf32>
    %223 = arith.truncf %222 : vector<2x64xf32> to vector<2x64xbf16>
    %cst_73 = arith.constant dense<0.000000e+00> : vector<2x128xf32>
    %224 = tpu.matmul %223, %206, %cst_73 {dimension_numbers = #tpu.dot_dimension_numbers<[1], [0], [0], [1], [0, 0, 1, 1], [], []>} : vector<2x64xbf16>, vector<64x128xbf16>, vector<2x128xf32> -> vector<2x128xf32>
    %225 = vector.broadcast %212 : vector<1x128xf32> to vector<2x128xf32>
    %226 = arith.addf %224, %225 : vector<2x128xf32>
    %227 = math.tanh %226 : vector<2x128xf32>
    %228 = vector.extract_strided_slice %227 {offsets = [0, 0], sizes = [1, 32], strides = [1, 1]} : vector<2x128xf32> to vector<1x32xf32>
    %229 = vector.extract_strided_slice %227 {offsets = [1, 0], sizes = [1, 32], strides = [1, 1]} : vector<2x128xf32> to vector<1x32xf32>
    %230 = vector.extract_strided_slice %208 {offsets = [0, 0], sizes = [32, 128], strides = [1, 1]} : vector<64x128xbf16> to vector<32x128xbf16>
    %cst_74 = arith.constant dense<0.000000e+00> : vector<8x128xf32>
    %231 = tpu.matmul %221, %230, %cst_74 {dimension_numbers = #tpu.dot_dimension_numbers<[1], [0], [0], [1], [0, 0, 1, 1], [], []>} : vector<8x32xbf16>, vector<32x128xbf16>, vector<8x128xf32> -> vector<8x128xf32>
    %232 = arith.truncf %229 : vector<1x32xf32> to vector<1x32xbf16>
    %233 = vector.extract_strided_slice %208 {offsets = [32, 0], sizes = [32, 128], strides = [1, 1]} : vector<64x128xbf16> to vector<32x128xbf16>
    %cst_75 = arith.constant dense<0.000000e+00> : vector<1x128xf32>
    %234 = tpu.matmul %232, %233, %cst_75 {dimension_numbers = #tpu.dot_dimension_numbers<[1], [0], [0], [1], [0, 0, 1, 1], [], []>} : vector<1x32xbf16>, vector<32x128xbf16>, vector<1x128xf32> -> vector<1x128xf32>
    %235 = vector.broadcast %234 : vector<1x128xf32> to vector<8x128xf32>
    %236 = arith.addf %231, %235 : vector<8x128xf32>
    %237 = vector.broadcast %220 : vector<1x128xf32> to vector<8x128xf32>
    %238 = arith.addf %236, %237 : vector<8x128xf32>
    %239 = vector.extract_strided_slice %238 {offsets = [0, 0], sizes = [8, 1], strides = [1, 1]} : vector<8x128xf32> to vector<8x1xf32>
    %cst_76 = arith.constant dense<0xFF800000> : vector<1xf32>
    %240 = vector.multi_reduction <maximumf>, %239, %cst_76 [0] : vector<8x1xf32> to vector<1xf32>
    %241 = vector.shape_cast %240 : vector<1xf32> to vector<1x1xf32>
    %242 = vector.broadcast %241 : vector<1x1xf32> to vector<8x1xf32>
    %243 = arith.subf %239, %242 : vector<8x1xf32>
    %244 = math.exp %243 : vector<8x1xf32>
    %cst_77 = arith.constant dense<0.000000e+00> : vector<1xf32>
    %245 = vector.multi_reduction <add>, %244, %cst_77 [0] : vector<8x1xf32> to vector<1xf32>
    %246 = vector.shape_cast %245 : vector<1xf32> to vector<1x1xf32>
    %247 = tpu.reciprocal %246 {approx = true} : vector<1x1xf32> -> vector<1x1xf32>
    %248 = vector.broadcast %247 : vector<1x1xf32> to vector<8x1xf32>
    %249 = arith.mulf %244, %248 : vector<8x1xf32>
    %250 = vector.broadcast %249 : vector<8x1xf32> to vector<8x32xf32>
    %251 = arith.mulf %250, %205 : vector<8x32xf32>
    %cst_78 = arith.constant dense<0.000000e+00> : vector<32xf32>
    %252 = vector.multi_reduction <add>, %251, %cst_78 [0] : vector<8x32xf32> to vector<32xf32>
    %253 = vector.shape_cast %252 : vector<32xf32> to vector<1x32xf32>
    %254 = arith.truncf %253 : vector<1x32xf32> to vector<1x32xbf16>
    %255 = vector.extract_strided_slice %207 {offsets = [0, 0], sizes = [32, 128], strides = [1, 1]} : vector<64x128xbf16> to vector<32x128xbf16>
    %cst_79 = arith.constant dense<0.000000e+00> : vector<1x128xf32>
    %256 = tpu.matmul %254, %255, %cst_79 {dimension_numbers = #tpu.dot_dimension_numbers<[1], [0], [0], [1], [0, 0, 1, 1], [], []>} : vector<1x32xbf16>, vector<32x128xbf16>, vector<1x128xf32> -> vector<1x128xf32>
    %257 = arith.truncf %228 : vector<1x32xf32> to vector<1x32xbf16>
    %258 = vector.extract_strided_slice %207 {offsets = [32, 0], sizes = [32, 128], strides = [1, 1]} : vector<64x128xbf16> to vector<32x128xbf16>
    %cst_80 = arith.constant dense<0.000000e+00> : vector<1x128xf32>
    %259 = tpu.matmul %257, %258, %cst_80 {dimension_numbers = #tpu.dot_dimension_numbers<[1], [0], [0], [1], [0, 0, 1, 1], [], []>} : vector<1x32xbf16>, vector<32x128xbf16>, vector<1x128xf32> -> vector<1x128xf32>
    %260 = arith.addf %256, %259 : vector<1x128xf32>
    %261 = arith.addf %260, %214 : vector<1x128xf32>
    %262 = math.tanh %261 : vector<1x128xf32>
    %263 = vector.extract_strided_slice %262 {offsets = [0, 0], sizes = [1, 32], strides = [1, 1]} : vector<1x128xf32> to vector<1x32xf32>
    %264 = arith.truncf %263 : vector<1x32xf32> to vector<1x32xbf16>
    %cst_81 = arith.constant dense<0.000000e+00> : vector<1x128xf32>
    %265 = tpu.matmul %264, %209, %cst_81 {dimension_numbers = #tpu.dot_dimension_numbers<[1], [0], [0], [1], [0, 0, 1, 1], [], []>} : vector<1x32xbf16>, vector<32x128xbf16>, vector<1x128xf32> -> vector<1x128xf32>
    %266 = arith.addf %265, %216 : vector<1x128xf32>
    %267 = math.tanh %266 : vector<1x128xf32>
    %268 = vector.extract_strided_slice %267 {offsets = [0, 0], sizes = [1, 32], strides = [1, 1]} : vector<1x128xf32> to vector<1x32xf32>
    %269 = arith.truncf %268 : vector<1x32xf32> to vector<1x32xbf16>
    %cst_82 = arith.constant dense<0.000000e+00> : vector<1x128xf32>
    %270 = tpu.matmul %269, %210, %cst_82 {dimension_numbers = #tpu.dot_dimension_numbers<[1], [0], [0], [1], [0, 0, 1, 1], [], []>} : vector<1x32xbf16>, vector<32x128xbf16>, vector<1x128xf32> -> vector<1x128xf32>
    %271 = arith.addf %270, %218 : vector<1x128xf32>
    %272 = arith.negf %271 : vector<1x128xf32>
    %273 = math.exp %272 : vector<1x128xf32>
    %cst_83 = arith.constant 1.000000e+00 : f32
    %274 = vector.broadcast %cst_83 : f32 to vector<1x128xf32>
    %275 = arith.addf %274, %273 : vector<1x128xf32>
    %276 = arith.divf %274, %275 : vector<1x128xf32>
    %277 = vector.extract_strided_slice %276 {offsets = [0, 0], sizes = [1, 8], strides = [1, 1]} : vector<1x128xf32> to vector<1x8xf32>
    %c0_84 = arith.constant 0 : index
    %c0_85 = arith.constant 0 : index
    %278 = vector.load %arg4[%c0_84, %c0_85] : memref<1x8xf32, #tpu.memory_space<vmem>>, vector<1x8xf32>
    tpu.vector_store %arg4[%c0_84, %c0_85], %277 {strides = array<i32>} : memref<1x8xf32, #tpu.memory_space<vmem>>, vector<1x8xf32>,
    return
  }
}

</mosaic_0001>

<bundles_post_ra>
// kernel: dgl_agcn_pallas.1
= control target key start
LH: loop header
LB: loop body
LE: loop exit
PB: predicated region body
PF: predicated region fallthrough
CT: control target
= control target key end

     0   :  { %9 = vsyncpa [#allocation3], 0  ;;  %s3596_s0 = inlined_call_operand.vmem [shape: bf16[8,32], index: 0, kind: input, shape index: {}]   ;;  %s3597_s1 = inlined_call_operand.vmem [shape: f32[8,32], index: 1, kind: input, shape index: {}]   ;;  %s3598_s2 = inlined_call_operand.vmem [shape: f32[2,64], index: 2, kind: input, shape index: {}]   ;;  %s3599_s3 = inlined_call_operand.hbm [shape: bf16[1296,128], index: 3, kind: input, shape index: {}]   ;;  %s3600_s4 = inlined_call_operand.hbm [shape: f32[1,8], index: 4, kind: output, shape index: {}]  }
   0x1   :  { %10 = vsyncpa [#allocation4], 0  ;;  %s3078_s15 = smov [#allocation2]  }
   0x2   :  { %s22_s16 = sshll.u32 %s3078_s15, 4  ;;  %s23_s16 = int_to_ptr.vmem [resolvable:$true] %s22_s16 }
   0x3   :  { %s3042_s17 = scalar_lea.vmem %s23_s16, 10368  ;;  %p3047_p1 = scmp.lt.s32.totalorder %s23_s16, %s23_s16 }
   0x4   :  { %p3043_p0 = scmp.ne.s32.totalorder %s23_s16, %s3042_s17  ;;  %p3048_p2 = scmp.lt.s32.totalorder %s3042_s17, %s3042_s17 }
   0x6   :  { %p3049_p3 = por %p3048_p2, %p3047_p1 }
   0x8   :  { %p3050_p4 = pnand %p3049_p3, %p3043_p0 }
   0xa   :  { %3053 = shalt.err (!%p3050_p4)
}
   0xb   :  { %s3079_s18 = smov 64   ;;  %s3080_s19 = smov 4  }
   0xc   :  { %28 = dma.hbm_to_vmem [thread:$0]  %s3599_s3, 10368, %s23_s16, [#allocation3], %s3079_s18, %s3079_s18, %s3080_s19  }
   0xd   :  { %3074 = dma.done.wait [#allocation3], 10368  }
   0xe   :  { %3075 = vsyncadd [#allocation3], 4294956928  ;;  %v3081_v0 = vmov 0.0   ;;  %vm3082_vm0 = vmmov 0   ;;  %v2916_v1 = vld [vmem:[#allocation2 + $0x8] sm:$0xff]   ;;  %v2917_v2 = vld [vmem:[#allocation2] sm:$0xff]  }
   0xf   :  { %2473 = vmatprep.subr.bf16.mxu0 %v3081_v0  ;;  %2477 = vmatprep.mubr.msk.bf16.mxu0 %vm3082_vm0, %v3081_v0  ;;  %v3126_v3 = vld [vmem:[%s3597_s1] sm:$0xff]  ;;  %vm124_vm1 = vcmask 261120   ;;  %v2918_v5 = vld [vmem:[#allocation2 + $0x48] sm:$0xff]   ;;  %v2920_v7 = vld [vmem:[#allocation2 + $0x38] sm:$0xff]   ;;  %s3084_s24 = smov 32   ;;  %vm1696_vm2 = vcmask 523264  }
  0x10   :  { %2481 = vmatprep.subr.bf16.mxu1 %v3081_v0  ;;  %2485 = vmatprep.mubr.msk.bf16.mxu1 %vm3082_vm0, %v3081_v0  ;;  %v3131_v4 = vpack.c.bf16 %v3126_v3, %v3126_v3  ;;  %v2919_v6 = vld [vmem:[#allocation2 + $0x40] sm:$0xff]   ;;  %v2921_v8 = vld [vmem:[#allocation2 + $0x30] sm:$0xff]   ;;  %v2922_v9 = vld [vmem:[#allocation2 + $0x28] sm:$0xff]   ;;  %vm1867_vm3 = vcmask 7168   ;;  %vm1893_vm4 = vcmask 523520   ;;  %vm2143_vm5 = vcmask 57344  }
  0x11   :  { %2474 = vmatpush3.bf16.msra.mxu0 %v2916_v1  ;;  %v2923_v10 = vld [vmem:[#allocation2 + $0x20] sm:$0xff]   ;;  %v2924_v11 = vld [vmem:[#allocation2 + $0x18] sm:$0xff]   ;;  %v2281_v19 = vld [vmem:[#allocation2 + $0x1f0] sm:$0xff]  }
  0x12   :  { %2475 = vmatprep.subr.bf16.mxu0 %v3081_v0  ;;  %v3145_v12 = vld [vmem:[#allocation2 + $0x60] sm:$0xff]   ;;  %v2280_v20 = vld [vmem:[#allocation2 + $0x1e8] sm:$0xff]   ;;  %v3148_v21 = vunpack.c.l.bf16 %v2281_v19  ;;  %v3150_v22 = vunpack.c.h.bf16 %v2281_v19  ;;  %v2925_v33 = vld [vmem:[#allocation2 + $0x10] sm:$0xff]  }
  0x13   :  { %v2258_v13 = vunpack.c.l.bf16 %v3145_v12  ;;  %v3152_v23 = vunpack.c.l.bf16 %v2280_v20  ;;  %v3154_v24 = vunpack.c.h.bf16 %v2280_v20  ;;  %v3164_v32 = vld [vmem:[%s3596_s0] sm:$0xf]  ;;  %v2926_v34 = vld [vmem:[#allocation2 + $0x58] sm:$0xff]   ;;  %v2927_v35 = vld [vmem:[#allocation2 + $0x50] sm:$0xff]   ;;  %s3083_s0 = smov 96  }
  0x14   :  { %v3173_v36 = vld [vmem:[#allocation2 + $0x1a0] sm:$0xff]   ;;  %v3179_v37 = vld [vmem:[#allocation2 + $0x198] sm:$0xff]   ;;  %v3185_v38 = vld [vmem:[#allocation2 + $0x190] sm:$0xff]  }
  0x15   :  { %2476 = vmatpush3.bf16.msra.mxu0 %v2917_v2  ;;  %v3189_v39 = vld [vmem:[#allocation2 + $0x188] sm:$0xff]   ;;  %v3193_v40 = vld [vmem:[#allocation2 + $0x180] sm:$0xff]   ;;  %v3197_v41 = vld [vmem:[#allocation2 + $0x178] sm:$0xff]  }
  0x16   :  { %2489 = vmatprep.subr.bf16.mxu0 %v3081_v0  ;;  %v3201_v42 = vld [vmem:[#allocation2 + $0x170] sm:$0xff]   ;;  %v3205_v43 = vld [vmem:[#allocation2 + $0x168] sm:$0xff]   ;;  %v3214_v53 = vld [vmem:[#allocation2 + $0x1e0] sm:$0xff]  }
  0x17   :  { %v3217_v54 = vld [vmem:[#allocation2 + $0x1d8] sm:$0xff]   ;;  %v3221_v55 = vld [vmem:[#allocation2 + $0x1d0] sm:$0xff]   ;;  %v3225_v56 = vld [vmem:[#allocation2 + $0x1c8] sm:$0xff]  }
  0x18   :  { %2478 = vmatmul.mubr.msk.bf16.vlgmr.msra.gmra.mxu0 %vm124_vm1, %v3131_v4  ;;  %v3229_v57 = vld [vmem:[#allocation2 + $0x1c0] sm:$0xff]   ;;  %v3233_v58 = vld [vmem:[#allocation2 + $0x1b8] sm:$0xff]   ;;  %v3237_v59 = vld [vmem:[#allocation2 + $0x1b0] sm:$0xff]  }
  0x19   :  { %2505 = vmatprep.mubr.msk.bf16.mxu0 %vm3082_vm0, %v3081_v0  ;;  %2490 = vmatpush3.bf16.msra.mxu0 %v2918_v5  ;;  %v74_v20 = vld [vmem:[#allocation2 + $0x70] ss:$392 sps:$4 sm:$0xff]  }
  0x1a   :  { %2491 = vmatprep.subr.bf16.mxu0 %v3081_v0 }
  0x1d   :  { %2492 = vmatpush3.bf16.msra.mxu0 %v2919_v6 }
  0x1e   :  { %2493 = vmatprep.subr.bf16.mxu0 %v3081_v0 }
  0x21   :  { %2494 = vmatpush3.bf16.msra.mxu0 %v2920_v7 }
  0x22   :  { %2495 = vmatprep.subr.bf16.mxu0 %v3081_v0 }
  0x25   :  { %2496 = vmatpush3.bf16.msra.mxu0 %v2921_v8 }
  0x26   :  { %2497 = vmatprep.subr.bf16.mxu0 %v3081_v0 }
  0x29   :  { %2498 = vmatpush3.bf16.msra.mxu0 %v2922_v9 }
  0x2a   :  { %2499 = vmatprep.subr.bf16.mxu0 %v3081_v0 }
  0x2d   :  { %2500 = vmatpush3.bf16.msra.mxu0 %v2923_v10 }
  0x2e   :  { %2501 = vmatprep.subr.bf16.mxu0 %v3081_v0 }
  0x31   :  { %2502 = vmatpush3.bf16.msra.mxu0 %v2924_v11 }
  0x32   :  { %2503 = vmatprep.subr.bf16.mxu0 %v3081_v0 }
  0x35   :  { %2504 = vmatpush3.bf16.msra.mxu0 %v2925_v33 }
  0x36   :  { %2537 = vmatprep.subr.bf16.mxu0 %v3081_v0 }
  0xd8   :  { %v162_v14 = vpop.f32.mrf.mxu0 }
  0xd9   :  { %v163_v15 = vadd.f32 %v2258_v13, %v162_v14 }
  0xda   :  { %v2479_v16 = vpop.f32.mrf.mxu0 }
  0xdb   :  { %2984 = vtanh.f32 %v163_v15 }
  0xdc   :  { %v165_v17 = vpop.f32.mrf.mxu0 }
  0xde   :  { %v2480_v18 = vpop.f32.mrf.mxu0 }
  0xe8   :  { %v2985_v25 = vpop.eup %2984 }
  0xe9   :  { %v171_v26 = vmul.f32 %v2985_v25, %v3148_v21  ;;  %v172_v27 = vmul.f32 %v2985_v25, %v3150_v22  ;;  %v169_v29 = vmul.f32 %v2985_v25, %v3152_v23  ;;  %v170_v30 = vmul.f32 %v2985_v25, %v3154_v24 }
  0xea   :  { %v3289_v25 = vunpack.c.h.bf16 %v74_v20 }
  0xeb   :  { %v174_v28 = vpack.c.bf16 %v172_v27, %v171_v26  ;;  %v173_v31 = vpack.c.bf16 %v170_v30, %v169_v29 }
  0xed   :  { %2482 = vmatpush3.bf16.msra.mxu1 %v174_v28 }
  0xee   :  { %2483 = vmatprep.subr.bf16.mxu1 %v3081_v0 }
  0xf1   :  { %2484 = vmatpush3.bf16.msra.mxu1 %v173_v31  ;;  %v2283_v31 = vld [vmem:[#allocation2 + $0x68] sm:$0xff]  }
  0xf2   :  { %2509 = vmatprep.subr.bf16.mxu1 %v3081_v0  ;;  %v2263_v33 = vunpack.c.h.bf16 %v2283_v31 }
  0xf4   :  { %2486 = vmatmul.mubr.msk.bf16.vlgmr.msra.gmra.mxu1 %vm124_vm1, %v3164_v32 }
  0xf5   :  { %2513 = vmatprep.mubr.msk.bf16.mxu1 %vm3082_vm0, %v3081_v0  ;;  %2510 = vmatpush3.bf16.msra.mxu1 %v2926_v34 }
  0xf6   :  { %2511 = vmatprep.subr.bf16.mxu1 %v3081_v0 }
  0xf9   :  { %2512 = vmatpush3.bf16.msra.mxu1 %v2927_v35  ;;  %v2259_v35 = vunpack.c.h.bf16 %v3145_v12 }
  0xfa   :  { %2517 = vmatprep.subr.bf16.mxu1 %v3081_v0 }
  0xfc   :  { %2514 = vmatmul.mubr.msk.bf16.vlgmr.msra.gmra.mxu1 %vm124_vm1, %v3131_v4  ;;  %v3264_v4 = vld [vmem:[#allocation2 + $0x1a8] sm:$0xff]  }
  0xfd   :  { %2518 = vmatpush3.bf16.msra.mxu1 %v3173_v36  ;;  %2533 = vmatprep.mubr.msk.bf16.mxu1 %vm3082_vm0, %v3081_v0 }
  0xfe   :  { %2519 = vmatprep.subr.bf16.mxu1 %v3081_v0 }
 0x101   :  { %2520 = vmatpush3.bf16.msra.mxu1 %v3179_v37 }
 0x102   :  { %2521 = vmatprep.subr.bf16.mxu1 %v3081_v0 }
 0x105   :  { %2522 = vmatpush3.bf16.msra.mxu1 %v3185_v38 }
 0x106   :  { %2523 = vmatprep.subr.bf16.mxu1 %v3081_v0 }
 0x109   :  { %2524 = vmatpush3.bf16.msra.mxu1 %v3189_v39 }
 0x10a   :  { %2525 = vmatprep.subr.bf16.mxu1 %v3081_v0 }
 0x10d   :  { %2526 = vmatpush3.bf16.msra.mxu1 %v3193_v40 }
 0x10e   :  { %2527 = vmatprep.subr.bf16.mxu1 %v3081_v0 }
 0x111   :  { %2528 = vmatpush3.bf16.msra.mxu1 %v3197_v41 }
 0x112   :  { %2529 = vmatprep.subr.bf16.mxu1 %v3081_v0 }
 0x115   :  { %2530 = vmatpush3.bf16.msra.mxu1 %v3201_v42 }
 0x116   :  { %2531 = vmatprep.subr.bf16.mxu1 %v3081_v0 }
 0x119   :  { %2532 = vmatpush3.bf16.msra.mxu1 %v3205_v43 }
 0x11a   :  { %2557 = vmatprep.subr.bf16.mxu1 %v3081_v0 }
 0x1b4   :  { %v212_v44 = vpop.f32.mrf.mxu1 }
 0x1b5   :  { %v218_v45 = vpack.c.bf16 %v212_v44, %v212_v44 }
 0x1b6   :  { %v2487_v46 = vpop.f32.mrf.mxu1 }
 0x1b7   :  { %2506 = vmatmul.mubr.bf16.vlgmr.msra.gmra.mxu0 %v218_v45 }
 0x1b8   :  { %v215_v47 = vpop.f32.mrf.mxu1  ;;  %2553 = vmatprep.mubr.msk.bf16.mxu0 %vm3082_vm0, %v3081_v0  ;;  %2538 = vmatpush3.bf16.msra.mxu0 %v3214_v53 }
 0x1b9   :  { %2539 = vmatprep.subr.bf16.mxu0 %v3081_v0 }
 0x1ba   :  { %v2488_v48 = vpop.f32.mrf.mxu1 }
 0x1bc   :  { %v3212_v49 = vpop.f32.mrf.mxu1  ;;  %2540 = vmatpush3.bf16.msra.mxu0 %v3217_v54 }
 0x1bd   :  { %2541 = vmatprep.subr.bf16.mxu0 %v3081_v0  ;;  %v543_v2 = vpack.c.bf16 %v3212_v49, %v3212_v49 }
 0x1be   :  { %v2515_v50 = vpop.f32.mrf.mxu1 }
 0x1c0   :  { %v356_v51 = vpop.f32.mrf.mxu1  ;;  %2542 = vmatpush3.bf16.msra.mxu0 %v3221_v55 }
 0x1c1   :  { %2543 = vmatprep.subr.bf16.mxu0 %v3081_v0 }
 0x1c2   :  { %v2516_v52 = vpop.f32.mrf.mxu1 }
 0x1c3   :  { %v110_v52 = vunpack.c.l.bf16 %v74_v20 }
 0x1c4   :  { %2544 = vmatpush3.bf16.msra.mxu0 %v3225_v56 }
 0x1c5   :  { %2545 = vmatprep.subr.bf16.mxu0 %v3081_v0 }
 0x1c8   :  { %2546 = vmatpush3.bf16.msra.mxu0 %v3229_v57 }
 0x1c9   :  { %2547 = vmatprep.subr.bf16.mxu0 %v3081_v0 }
 0x1cc   :  { %2548 = vmatpush3.bf16.msra.mxu0 %v3233_v58 }
 0x1cd   :  { %2549 = vmatprep.subr.bf16.mxu0 %v3081_v0 }
 0x1d0   :  { %2550 = vmatpush3.bf16.msra.mxu0 %v3237_v59 }
 0x1d1   :  { %2551 = vmatprep.subr.bf16.mxu0 %v3081_v0 }
 0x1d4   :  { %2552 = vmatpush3.bf16.msra.mxu0 %v3264_v4 }
 0x1d5   :  { %2577 = vmatprep.subr.bf16.mxu0 %v3081_v0 }
 0x277   :  { %v301_v60 = vpop.f32.mrf.mxu0 }
 0x278   :  { %v359_v61 = vpack.c.bf16 %v301_v60, %v301_v60 }
 0x279   :  { %v2507_v62 = vpop.f32.mrf.mxu0 }
 0x27a   :  { %2534 = vmatmul.mubr.bf16.vlgmr.msra.gmra.mxu1 %v359_v61  ;;  %v2262_v61 = vunpack.c.l.bf16 %v2283_v31 }
 0x27b   :  { %2558 = vmatpush3.bf16.msra.mxu1 %v3173_v36  ;;  %v304_v63 = vpop.f32.mrf.mxu0  ;;  %2573 = vmatprep.mubr.msk.bf16.mxu1 %vm3082_vm0, %v3081_v0 }
 0x27c   :  { %2559 = vmatprep.subr.bf16.mxu1 %v3081_v0 }
 0x27d   :  { %v2508_v1 = vpop.f32.mrf.mxu0 }
 0x27f   :  { %2560 = vmatpush3.bf16.msra.mxu1 %v3179_v37 }
 0x280   :  { %2561 = vmatprep.subr.bf16.mxu1 %v3081_v0 }
 0x283   :  { %2562 = vmatpush3.bf16.msra.mxu1 %v3185_v38 }
 0x284   :  { %2563 = vmatprep.subr.bf16.mxu1 %v3081_v0 }
 0x287   :  { %2564 = vmatpush3.bf16.msra.mxu1 %v3189_v39 }
 0x288   :  { %2565 = vmatprep.subr.bf16.mxu1 %v3081_v0 }
 0x28b   :  { %2566 = vmatpush3.bf16.msra.mxu1 %v3193_v40 }
 0x28c   :  { %2567 = vmatprep.subr.bf16.mxu1 %v3081_v0 }
 0x28f   :  { %2568 = vmatpush3.bf16.msra.mxu1 %v3197_v41 }
 0x290   :  { %2569 = vmatprep.subr.bf16.mxu1 %v3081_v0 }
 0x293   :  { %2570 = vmatpush3.bf16.msra.mxu1 %v3201_v42 }
 0x294   :  { %2571 = vmatprep.subr.bf16.mxu1 %v3081_v0 }
 0x297   :  { %2572 = vmatpush3.bf16.msra.mxu1 %v3205_v43 }
 0x298   :  { %2597 = vmatprep.subr.bf16.mxu1 %v3081_v0 }
 0x29a   :  { %2574 = vmatmul.mubr.bf16.vlgmr.msra.gmra.mxu1 %v543_v2 }
 0x29b   :  { %2601 = vmatprep.mubr.msk.bf16.mxu1 %vm3082_vm0, %v3081_v0 }
 0x33a   :  { %v442_v5 = vpop.f32.mrf.mxu1 }
 0x33b   :  { %v448_v6 = vsub.f32 %v301_v60, %v442_v5 }
 0x33c   :  { %v2535_v7 = vpop.f32.mrf.mxu1 }
 0x33d   :  { %v449_v8 = vmul.f32 %v448_v6, %v448_v6 }
 0x33e   :  { %v445_v9 = vpop.f32.mrf.mxu1 }
 0x33f   :  { %v450_v10 = vpack.c.bf16 %v449_v8, %v449_v8 }
 0x340   :  { %v2536_v11 = vpop.f32.mrf.mxu1 }
 0x341   :  { %2554 = vmatmul.mubr.bf16.vlgmr.msra.gmra.mxu0 %v450_v10 }
 0x342   :  { %2578 = vmatpush3.bf16.msra.mxu0 %v3214_v53  ;;  %2593 = vmatprep.mubr.msk.bf16.mxu0 %vm3082_vm0, %v3081_v0 }
 0x343   :  { %2579 = vmatprep.subr.bf16.mxu0 %v3081_v0 }
 0x346   :  { %2580 = vmatpush3.bf16.msra.mxu0 %v3217_v54 }
 0x347   :  { %2581 = vmatprep.subr.bf16.mxu0 %v3081_v0 }
 0x34a   :  { %2582 = vmatpush3.bf16.msra.mxu0 %v3221_v55 }
 0x34b   :  { %2583 = vmatprep.subr.bf16.mxu0 %v3081_v0 }
 0x34e   :  { %2584 = vmatpush3.bf16.msra.mxu0 %v3225_v56 }
 0x34f   :  { %2585 = vmatprep.subr.bf16.mxu0 %v3081_v0 }
 0x352   :  { %2586 = vmatpush3.bf16.msra.mxu0 %v3229_v57 }
 0x353   :  { %2587 = vmatprep.subr.bf16.mxu0 %v3081_v0 }
 0x356   :  { %2588 = vmatpush3.bf16.msra.mxu0 %v3233_v58 }
 0x357   :  { %2589 = vmatprep.subr.bf16.mxu0 %v3081_v0 }
 0x35a   :  { %v578_v13 = vpop.f32.mrf.mxu1  ;;  %2590 = vmatpush3.bf16.msra.mxu0 %v3237_v59 }
 0x35b   :  { %v584_v14 = vsub.f32 %v3212_v49, %v578_v13  ;;  %2591 = vmatprep.subr.bf16.mxu0 %v3081_v0  ;;  %v2944_v13 = vld [vmem:[#allocation2 + $0x80] sm:$0xff]  }
 0x35c   :  { %v2575_v15 = vpop.f32.mrf.mxu1  ;;  %2598 = vmatpush3.bf16.msra.mxu1 %v2944_v13 }
 0x35d   :  { %v585_v16 = vmul.f32 %v584_v14, %v584_v14  ;;  %v2945_v15 = vld [vmem:[#allocation2 + $0xd0] sm:$0xff]   ;;  %2599 = vmatprep.subr.bf16.mxu1 %v3081_v0 }
 0x35e   :  { %v581_v17 = vpop.f32.mrf.mxu1  ;;  %2592 = vmatpush3.bf16.msra.mxu0 %v3264_v4 }
 0x35f   :  { %v586_v18 = vpack.c.bf16 %v585_v16, %v585_v16  ;;  %2633 = vmatprep.subr.bf16.mxu0 %v3081_v0  ;;  %v2946_v16 = vld [vmem:[#allocation2 + $0x78] sm:$0xff]   ;;  %v2947_v17 = vld [vmem:[#allocation2 + $0xc8] sm:$0xff]  }
 0x360   :  { %v2576_v19 = vpop.f32.mrf.mxu1  ;;  %2600 = vmatpush3.bf16.msra.mxu1 %v2946_v16 }
 0x361   :  { %2594 = vmatmul.mubr.bf16.vlgmr.msra.gmra.mxu0 %v586_v18  ;;  %2605 = vmatprep.subr.bf16.mxu1 %v3081_v0 }
 0x362   :  { %2637 = vmatprep.mubr.msk.bf16.mxu0 %vm3082_vm0, %v3081_v0  ;;  %2634 = vmatpush3.bf16.msra.mxu0 %v2945_v15 }
 0x363   :  { %2635 = vmatprep.subr.bf16.mxu0 %v3081_v0 }
 0x366   :  { %2636 = vmatpush3.bf16.msra.mxu0 %v2947_v17 }
 0x367   :  { %2641 = vmatprep.subr.bf16.mxu0 %v3081_v0 }
 0x401   :  { %v533_v26 = vpop.f32.mrf.mxu0 }
 0x402   :  { %v534_v27 = vadd.f32 %v533_v26, %v3289_v25 }
 0x403   :  { %v2555_v28 = vpop.f32.mrf.mxu0 }
 0x404   :  { %2986 = vrsqrt.f32 %v534_v27 }
 0x405   :  { %v536_v29 = vpop.f32.mrf.mxu0 }
 0x407   :  { %v2556_v30 = vpop.f32.mrf.mxu0 }
 0x411   :  { %v2987_v34 = vpop.eup %2986 }
 0x412   :  { %v540_v44 = vmul.f32 %v2987_v34, %v2263_v33 }
 0x414   :  { %v541_v45 = vmul.f32 %v540_v44, %v448_v6 }
 0x416   :  { %v542_v46 = vadd.f32 %v2259_v35, %v541_v45 }
 0x421   :  { %v621_v47 = vpop.f32.mrf.mxu0 }
 0x422   :  { %v622_v48 = vadd.f32 %v621_v47, %v3289_v25 }
 0x423   :  { %v2595_v49 = vpop.f32.mrf.mxu0 }
 0x424   :  { %2988 = vrsqrt.f32 %v622_v48 }
 0x425   :  { %v624_v50 = vpop.f32.mrf.mxu0 }
 0x427   :  { %v2596_v51 = vpop.f32.mrf.mxu0 }
 0x431   :  { %v2989_v60 = vpop.eup %2988 }
 0x432   :  { %v628_v62 = vmul.f32 %v2989_v60, %v110_v52 }
 0x434   :  { %v629_v63 = vmul.f32 %v628_v62, %v584_v14 }
 0x436   :  { %v630_v1 = vadd.f32 %v2262_v61, %v629_v63 }
 0x438   :  { %639 = vrot.lane.b32.xlu0 %v630_v1, %s3079_s18  ;;  %v631_v2 = vadd.f32 %v630_v1, %v542_v46  ;;  %v2948_v1 = vld [vmem:[#allocation2 + $0xc0] sm:$0xff]  }
 0x43a   :  { %v2191_v12 = vmul.f32 -1.442695, %v631_v2  ;;  %v2949_v2 = vld [vmem:[#allocation2 + $0xb8] sm:$0xff]  }
 0x43c   :  { %2990 = vpow2.f32 %v2191_v12  ;;  %v2950_v12 = vld [vmem:[#allocation2 + $0xb0] sm:$0xff]  }
 0x449   :  { %v2991_v5 = vpop.eup %2990 }
 0x44a   :  { %v635_v6 = vadd.f32 1.0, %v2991_v5  ;;  %v2951_v5 = vld [vmem:[#allocation2 + $0xa8] sm:$0xff]  }
 0x44c   :  { %2992 = vrcp.f32 %v635_v6  ;;  %v2952_v6 = vld [vmem:[#allocation2 + $0xa0] sm:$0xff]  }
 0x459   :  { %v2993_v7 = vpop.eup %2992 }
 0x45a   :  { %v649_v19 = vsub.f32 1.0, %v2993_v7 }
 0x4aa   :  { %v640_v8 = vpop.permute.xlu0 %639 }
 0x4ab   :  { %v642_v9 = vmul.f32 %v2993_v7, %v640_v8  ;;  %v2954_v8 = vld [vmem:[#allocation2 + $0x90] sm:$0xff]  }
 0x4ad   :  { %644 = vrot.lane.b32.xlu0 %v642_v9, %s3079_s18  ;;  %v2955_v9 = vld [vmem:[#allocation2 + $0x88] sm:$0xff]  }
 0x51f   :  { %v645_v10 = vpop.permute.xlu0 %644 }
 0x520   :  { %v647_v11 = vadd.f32 %v645_v10, %v542_v46 }
 0x522   :  { %2994 = vtanh.f32 %v647_v11 }
 0x52f   :  { %v2995_v14 = vpop.eup %2994 }
 0x530   :  { %651 = vrot.lane.b32.xlu1 %v2995_v14, %s3083_s0 }
 0x534   :  { %656 = vrot.lane.b32.xlu1 %v3126_v3, %s3084_s24  ;;  %v3329_v3 = vld [vmem:[#allocation2 + $0xd8] sm:$0xff]  }
 0x535   :  { %v2266_v31 = vunpack.c.l.bf16 %v3329_v3 }
 0x5a2   :  { %v652_v18 = vpop.permute.xlu1 %651 }
 0x5a3   :  { %v654_v26 = vmul.f32 %v652_v18, %v649_v19 }
 0x5a6   :  { %v657_v20 = vpop.permute.xlu1 %656 }
 0x5a7   :  { %v659_v27 = vmul.f32 %v2993_v7, %v657_v20  ;;  %v2953_v7 = vld [vmem:[#allocation2 + $0x98] sm:$0xff]  }
 0x5a9   :  { %v3302_v28 = vadd.f32 %v659_v27, %v654_v26 }
 0x5ab   :  { %v695_v29 = vpack.c.bf16 %v3302_v28, %v3302_v28 }
 0x5ad   :  { %697 = vrot.lane.b32.xlu0 %v695_v29, %s3083_s0 }
 0x61f   :  { %v698_v30 = vpop.permute.xlu0 %697 }
 0x620   :  { %2602 = vmatmul.mubr.msk.bf16.vlgmr.msra.gmra.mxu1 %vm124_vm1, %v698_v30  ;;  %2638 = vmatmul.mubr.msk.bf16.vlgmr.msra.gmra.mxu0 %vm124_vm1, %v698_v30 }
 0x621   :  { %2609 = vmatprep.mubr.msk.bf16.mxu1 %vm3082_vm0, %v3081_v0  ;;  %2642 = vmatpush3.bf16.msra.mxu0 %v3173_v36 }
 0x622   :  { %2643 = vmatprep.subr.bf16.mxu0 %v3081_v0  ;;  %2657 = vmatprep.mubr.msk.bf16.mxu0 %vm3082_vm0, %v3081_v0 }
 0x625   :  { %2644 = vmatpush3.bf16.msra.mxu0 %v3179_v37 }
 0x626   :  { %2645 = vmatprep.subr.bf16.mxu0 %v3081_v0 }
 0x629   :  { %2646 = vmatpush3.bf16.msra.mxu0 %v3185_v38 }
 0x62a   :  { %2647 = vmatprep.subr.bf16.mxu0 %v3081_v0 }
 0x62d   :  { %2648 = vmatpush3.bf16.msra.mxu0 %v3189_v39 }
 0x62e   :  { %2649 = vmatprep.subr.bf16.mxu0 %v3081_v0 }
 0x631   :  { %2650 = vmatpush3.bf16.msra.mxu0 %v3193_v40 }
 0x632   :  { %2651 = vmatprep.subr.bf16.mxu0 %v3081_v0 }
 0x635   :  { %2652 = vmatpush3.bf16.msra.mxu0 %v3197_v41 }
 0x636   :  { %2653 = vmatprep.subr.bf16.mxu0 %v3081_v0 }
 0x639   :  { %2654 = vmatpush3.bf16.msra.mxu0 %v3201_v42 }
 0x63a   :  { %2655 = vmatprep.subr.bf16.mxu0 %v3081_v0 }
 0x63d   :  { %2656 = vmatpush3.bf16.msra.mxu0 %v3205_v43 }
 0x63e   :  { %2681 = vmatprep.subr.bf16.mxu0 %v3081_v0 }
 0x6e0   :  { %v748_v33 = vpop.f32.mrf.mxu1  ;;  %v3332_v34 = vpop.f32.mrf.mxu0 }
 0x6e1   :  { %v749_v35 = vadd.f32 %v2266_v31, %v748_v33  ;;  %v1030_v26 = vpack.c.bf16 %v3332_v34, %v3332_v34 }
 0x6e2   :  { %v2603_v44 = vpop.f32.mrf.mxu1  ;;  %v2639_v45 = vpop.f32.mrf.mxu0 }
 0x6e3   :  { %2996 = vtanh.f32 %v749_v35 }
 0x6e4   :  { %v751_v46 = vpop.f32.mrf.mxu1  ;;  %v939_v47 = vpop.f32.mrf.mxu0 }
 0x6e6   :  { %v2604_v48 = vpop.f32.mrf.mxu1  ;;  %v2640_v49 = vpop.f32.mrf.mxu0 }
 0x6f0   :  { %v2997_v50 = vpop.eup %2996 }
 0x6f1   :  { %v757_v51 = vmul.f32 %v2997_v50, %v3148_v21  ;;  %v758_v52 = vmul.f32 %v2997_v50, %v3150_v22  ;;  %v755_v61 = vmul.f32 %v2997_v50, %v3152_v23  ;;  %v756_v62 = vmul.f32 %v2997_v50, %v3154_v24 }
 0x6f3   :  { %v760_v60 = vpack.c.bf16 %v758_v52, %v757_v51  ;;  %v759_v63 = vpack.c.bf16 %v756_v62, %v755_v61 }
 0x6f5   :  { %2606 = vmatpush3.bf16.msra.mxu1 %v760_v60 }
 0x6f6   :  { %2607 = vmatprep.subr.bf16.mxu1 %v3081_v0 }
 0x6f9   :  { %2608 = vmatpush3.bf16.msra.mxu1 %v759_v63  ;;  %v2285_v63 = vld [vmem:[#allocation2 + $0xe0] sm:$0xff]  }
 0x6fa   :  { %2613 = vmatprep.subr.bf16.mxu1 %v3081_v0 }
 0x6fc   :  { %2610 = vmatmul.mubr.msk.bf16.vlgmr.msra.gmra.mxu1 %vm124_vm1, %v3164_v32 }
 0x6fd   :  { %2614 = vmatpush3.bf16.msra.mxu1 %v2948_v1  ;;  %2629 = vmatprep.mubr.msk.bf16.mxu1 %vm3082_vm0, %v3081_v0  ;;  %v2271_v1 = vunpack.c.h.bf16 %v2285_v63 }
 0x6fe   :  { %2615 = vmatprep.subr.bf16.mxu1 %v3081_v0 }
 0x701   :  { %2616 = vmatpush3.bf16.msra.mxu1 %v2949_v2 }
 0x702   :  { %2617 = vmatprep.subr.bf16.mxu1 %v3081_v0 }
 0x705   :  { %2618 = vmatpush3.bf16.msra.mxu1 %v2950_v12  ;;  %v2267_v12 = vunpack.c.h.bf16 %v3329_v3 }
 0x706   :  { %2619 = vmatprep.subr.bf16.mxu1 %v3081_v0 }
 0x709   :  { %2620 = vmatpush3.bf16.msra.mxu1 %v2951_v5 }
 0x70a   :  { %2621 = vmatprep.subr.bf16.mxu1 %v3081_v0 }
 0x70d   :  { %2622 = vmatpush3.bf16.msra.mxu1 %v2952_v6 }
 0x70e   :  { %2623 = vmatprep.subr.bf16.mxu1 %v3081_v0 }
 0x711   :  { %2624 = vmatpush3.bf16.msra.mxu1 %v2953_v7 }
 0x712   :  { %2625 = vmatprep.subr.bf16.mxu1 %v3081_v0 }
 0x715   :  { %2626 = vmatpush3.bf16.msra.mxu1 %v2954_v8 }
 0x716   :  { %2627 = vmatprep.subr.bf16.mxu1 %v3081_v0 }
 0x719   :  { %2628 = vmatpush3.bf16.msra.mxu1 %v2955_v9 }
 0x71a   :  { %2661 = vmatprep.subr.bf16.mxu1 %v3081_v0 }
 0x7bc   :  { %v795_v10 = vpop.f32.mrf.mxu1 }
 0x7bd   :  { %v801_v11 = vpack.c.bf16 %v795_v10, %v795_v10 }
 0x7be   :  { %v2611_v13 = vpop.f32.mrf.mxu1 }
 0x7bf   :  { %2630 = vmatmul.mubr.bf16.vlgmr.msra.gmra.mxu1 %v801_v11 }
 0x7c0   :  { %v798_v15 = vpop.f32.mrf.mxu1  ;;  %2662 = vmatpush3.bf16.msra.mxu1 %v3214_v53  ;;  %2677 = vmatprep.mubr.msk.bf16.mxu1 %vm3082_vm0, %v3081_v0 }
 0x7c1   :  { %2663 = vmatprep.subr.bf16.mxu1 %v3081_v0  ;;  %v3416_v15 = vld [vmem:[#allocation2 + $0xe8] ss:$120 sps:$4 sm:$0xff]  }
 0x7c2   :  { %v2612_v14 = vpop.f32.mrf.mxu1 }
 0x7c3   :  { %v694_v14 = vunpack.c.l.bf16 %v3416_v15 }
 0x7c4   :  { %2664 = vmatpush3.bf16.msra.mxu1 %v3217_v54 }
 0x7c5   :  { %2665 = vmatprep.subr.bf16.mxu1 %v3081_v0 }
 0x7c8   :  { %2666 = vmatpush3.bf16.msra.mxu1 %v3221_v55 }
 0x7c9   :  { %2667 = vmatprep.subr.bf16.mxu1 %v3081_v0 }
 0x7cc   :  { %2668 = vmatpush3.bf16.msra.mxu1 %v3225_v56 }
 0x7cd   :  { %2669 = vmatprep.subr.bf16.mxu1 %v3081_v0 }
 0x7d0   :  { %2670 = vmatpush3.bf16.msra.mxu1 %v3229_v57 }
 0x7d1   :  { %2671 = vmatprep.subr.bf16.mxu1 %v3081_v0 }
 0x7d4   :  { %2672 = vmatpush3.bf16.msra.mxu1 %v3233_v58 }
 0x7d5   :  { %2673 = vmatprep.subr.bf16.mxu1 %v3081_v0 }
 0x7d8   :  { %2674 = vmatpush3.bf16.msra.mxu1 %v3237_v59 }
 0x7d9   :  { %2675 = vmatprep.subr.bf16.mxu1 %v3081_v0 }
 0x7dc   :  { %2676 = vmatpush3.bf16.msra.mxu1 %v3264_v4 }
 0x7dd   :  { %2701 = vmatprep.subr.bf16.mxu1 %v3081_v0 }
 0x87f   :  { %v884_v16 = vpop.f32.mrf.mxu1 }
 0x880   :  { %v942_v17 = vpack.c.bf16 %v884_v16, %v884_v16 }
 0x881   :  { %v2631_v18 = vpop.f32.mrf.mxu1 }
 0x882   :  { %2658 = vmatmul.mubr.bf16.vlgmr.msra.gmra.mxu0 %v942_v17  ;;  %v2270_v17 = vunpack.c.l.bf16 %v2285_v63 }
 0x883   :  { %2682 = vmatpush3.bf16.msra.mxu0 %v3173_v36  ;;  %v887_v19 = vpop.f32.mrf.mxu1  ;;  %2697 = vmatprep.mubr.msk.bf16.mxu0 %vm3082_vm0, %v3081_v0 }
 0x884   :  { %2683 = vmatprep.subr.bf16.mxu0 %v3081_v0 }
 0x885   :  { %v2632_v20 = vpop.f32.mrf.mxu1 }
 0x887   :  { %2684 = vmatpush3.bf16.msra.mxu0 %v3179_v37 }
 0x888   :  { %2685 = vmatprep.subr.bf16.mxu0 %v3081_v0 }
 0x88b   :  { %2686 = vmatpush3.bf16.msra.mxu0 %v3185_v38 }
 0x88c   :  { %2687 = vmatprep.subr.bf16.mxu0 %v3081_v0 }
 0x88f   :  { %2688 = vmatpush3.bf16.msra.mxu0 %v3189_v39 }
 0x890   :  { %2689 = vmatprep.subr.bf16.mxu0 %v3081_v0 }
 0x893   :  { %2690 = vmatpush3.bf16.msra.mxu0 %v3193_v40 }
 0x894   :  { %2691 = vmatprep.subr.bf16.mxu0 %v3081_v0 }
 0x897   :  { %2692 = vmatpush3.bf16.msra.mxu0 %v3197_v41 }
 0x898   :  { %2693 = vmatprep.subr.bf16.mxu0 %v3081_v0 }
 0x89b   :  { %2694 = vmatpush3.bf16.msra.mxu0 %v3201_v42 }
 0x89c   :  { %2695 = vmatprep.subr.bf16.mxu0 %v3081_v0 }
 0x89f   :  { %2696 = vmatpush3.bf16.msra.mxu0 %v3205_v43 }
 0x8a0   :  { %2721 = vmatprep.subr.bf16.mxu0 %v3081_v0 }
 0x8a2   :  { %2698 = vmatmul.mubr.bf16.vlgmr.msra.gmra.mxu0 %v1030_v26 }
 0x8a3   :  { %2725 = vmatprep.mubr.msk.bf16.mxu0 %vm3082_vm0, %v3081_v0 }
 0x942   :  { %v977_v27 = vpop.f32.mrf.mxu0 }
 0x943   :  { %v983_v29 = vsub.f32 %v884_v16, %v977_v27 }
 0x944   :  { %v2659_v30 = vpop.f32.mrf.mxu0 }
 0x945   :  { %v984_v31 = vmul.f32 %v983_v29, %v983_v29 }
 0x946   :  { %v980_v33 = vpop.f32.mrf.mxu0 }
 0x947   :  { %v985_v35 = vpack.c.bf16 %v984_v31, %v984_v31 }
 0x948   :  { %v2660_v44 = vpop.f32.mrf.mxu0 }
 0x949   :  { %2678 = vmatmul.mubr.bf16.vlgmr.msra.gmra.mxu1 %v985_v35 }
 0x94a   :  { %2702 = vmatpush3.bf16.msra.mxu1 %v3214_v53  ;;  %2717 = vmatprep.mubr.msk.bf16.mxu1 %vm3082_vm0, %v3081_v0 }
 0x94b   :  { %2703 = vmatprep.subr.bf16.mxu1 %v3081_v0 }
 0x94e   :  { %2704 = vmatpush3.bf16.msra.mxu1 %v3217_v54 }
 0x94f   :  { %2705 = vmatprep.subr.bf16.mxu1 %v3081_v0 }
 0x952   :  { %2706 = vmatpush3.bf16.msra.mxu1 %v3221_v55 }
 0x953   :  { %2707 = vmatprep.subr.bf16.mxu1 %v3081_v0 }
 0x956   :  { %2708 = vmatpush3.bf16.msra.mxu1 %v3225_v56 }
 0x957   :  { %2709 = vmatprep.subr.bf16.mxu1 %v3081_v0 }
 0x95a   :  { %2710 = vmatpush3.bf16.msra.mxu1 %v3229_v57 }
 0x95b   :  { %2711 = vmatprep.subr.bf16.mxu1 %v3081_v0 }
 0x95e   :  { %2712 = vmatpush3.bf16.msra.mxu1 %v3233_v58 }
 0x95f   :  { %2713 = vmatprep.subr.bf16.mxu1 %v3081_v0 }
 0x962   :  { %v1065_v45 = vpop.f32.mrf.mxu0  ;;  %2714 = vmatpush3.bf16.msra.mxu1 %v3237_v59 }
 0x963   :  { %v1071_v46 = vsub.f32 %v3332_v34, %v1065_v45  ;;  %2715 = vmatprep.subr.bf16.mxu1 %v3081_v0  ;;  %v2956_v45 = vld [vmem:[#allocation2 + $0xf8] sm:$0xff]  }
 0x964   :  { %v2699_v47 = vpop.f32.mrf.mxu0  ;;  %2722 = vmatpush3.bf16.msra.mxu0 %v2956_v45 }
 0x965   :  { %v1072_v48 = vmul.f32 %v1071_v46, %v1071_v46  ;;  %v2957_v47 = vld [vmem:[#allocation2 + $0x148] sm:$0xff]   ;;  %2723 = vmatprep.subr.bf16.mxu0 %v3081_v0 }
 0x966   :  { %v1068_v49 = vpop.f32.mrf.mxu0  ;;  %2716 = vmatpush3.bf16.msra.mxu1 %v3264_v4 }
 0x967   :  { %v1073_v50 = vpack.c.bf16 %v1072_v48, %v1072_v48  ;;  %2757 = vmatprep.subr.bf16.mxu1 %v3081_v0  ;;  %v2959_v48 = vld [vmem:[#allocation2 + $0x140] sm:$0xff]  }
 0x968   :  { %v2700_v51 = vpop.f32.mrf.mxu0 }
 0x969   :  { %2718 = vmatmul.mubr.bf16.vlgmr.msra.gmra.mxu1 %v1073_v50 }
 0x96a   :  { %2761 = vmatprep.mubr.msk.bf16.mxu1 %vm3082_vm0, %v3081_v0  ;;  %2758 = vmatpush3.bf16.msra.mxu1 %v2957_v47 }
 0x96b   :  { %2759 = vmatprep.subr.bf16.mxu1 %v3081_v0 }
 0x96e   :  { %2760 = vmatpush3.bf16.msra.mxu1 %v2959_v48 }
 0x96f   :  { %2765 = vmatprep.subr.bf16.mxu1 %v3081_v0 }
 0xa09   :  { %v1020_v52 = vpop.f32.mrf.mxu1 }
 0xa0a   :  { %v1021_v60 = vadd.f32 %v1020_v52, %v3289_v25 }
 0xa0b   :  { %v2679_v61 = vpop.f32.mrf.mxu1 }
 0xa0c   :  { %2998 = vrsqrt.f32 %v1021_v60 }
 0xa0d   :  { %v1023_v34 = vpop.f32.mrf.mxu1 }
 0xa0f   :  { %v2680_v62 = vpop.f32.mrf.mxu1 }
 0xa19   :  { %v2999_v2 = vpop.eup %2998 }
 0xa1a   :  { %v1027_v5 = vmul.f32 %v2999_v2, %v2271_v1 }
 0xa1c   :  { %v1028_v6 = vmul.f32 %v1027_v5, %v983_v29 }
 0xa1e   :  { %v1029_v7 = vadd.f32 %v2267_v12, %v1028_v6 }
 0xa29   :  { %v1108_v8 = vpop.f32.mrf.mxu1 }
 0xa2a   :  { %v1109_v9 = vadd.f32 %v1108_v8, %v3289_v25 }
 0xa2b   :  { %v2719_v10 = vpop.f32.mrf.mxu1 }
 0xa2c   :  { %3000 = vrsqrt.f32 %v1109_v9 }
 0xa2d   :  { %v1111_v11 = vpop.f32.mrf.mxu1 }
 0xa2f   :  { %v2720_v13 = vpop.f32.mrf.mxu1 }
 0xa39   :  { %v3001_v16 = vpop.eup %3000 }
 0xa3a   :  { %v1115_v18 = vmul.f32 %v3001_v16, %v694_v14 }
 0xa3c   :  { %v1116_v19 = vmul.f32 %v1115_v18, %v1071_v46  ;;  %v2958_v46 = vld [vmem:[#allocation2 + $0xf0] sm:$0xff]  }
 0xa3d   :  { %2724 = vmatpush3.bf16.msra.mxu0 %v2958_v46 }
 0xa3e   :  { %v1117_v20 = vadd.f32 %v2270_v17, %v1116_v19  ;;  %2729 = vmatprep.subr.bf16.mxu0 %v3081_v0 }
 0xa40   :  { %1126 = vrot.lane.b32.xlu1 %v1117_v20, %s3079_s18  ;;  %v1118_v3 = vadd.f32 %v1117_v20, %v1029_v7  ;;  %v2960_v20 = vld [vmem:[#allocation2 + $0x138] sm:$0xff]  }
 0xa42   :  { %v2207_v26 = vmul.f32 -1.442695, %v1118_v3  ;;  %v2966_v3 = vld [vmem:[#allocation2 + $0x108] sm:$0xff]  }
 0xa44   :  { %3002 = vpow2.f32 %v2207_v26  ;;  %v2967_v26 = vld [vmem:[#allocation2 + $0x100] sm:$0xff]  }
 0xa51   :  { %v3003_v27 = vpop.eup %3002 }
 0xa52   :  { %v1122_v29 = vadd.f32 1.0, %v3003_v27 }
 0xa54   :  { %3004 = vrcp.f32 %v1122_v29 }
 0xa61   :  { %v3005_v30 = vpop.eup %3004 }
 0xa62   :  { %v1136_v50 = vsub.f32 1.0, %v3005_v30  ;;  %v1142_v52 = vmul.f32 %v3005_v30, %v3302_v28  ;;  %v3454_v28 = vld [vmem:[#allocation2 + $0x150] sm:$0xff]  }
 0xa63   :  { %v2274_v63 = vunpack.c.l.bf16 %v3454_v28 }
 0xab2   :  { %v1127_v31 = vpop.permute.xlu1 %1126 }
 0xab3   :  { %v1129_v33 = vmul.f32 %v3005_v30, %v1127_v31 }
 0xab5   :  { %1131 = vrot.lane.b32.xlu0 %v1129_v33, %s3079_s18 }
 0xb27   :  { %v1132_v35 = vpop.permute.xlu0 %1131 }
 0xb28   :  { %v1134_v44 = vadd.f32 %v1132_v35, %v1029_v7 }
 0xb2a   :  { %3006 = vtanh.f32 %v1134_v44 }
 0xb37   :  { %v3007_v49 = vpop.eup %3006 }
 0xb38   :  { %1138 = vrot.lane.b32.xlu1 %v3007_v49, %s3083_s0 }
 0xbaa   :  { %v1139_v51 = vpop.permute.xlu1 %1138 }
 0xbab   :  { %v1141_v60 = vmul.f32 %v1139_v51, %v1136_v50 }
 0xbad   :  { %v3427_v61 = vadd.f32 %v1142_v52, %v1141_v60  ;;  %v2287_v60 = vld [vmem:[#allocation2 + $0x158] sm:$0xff]  }
 0xbaf   :  { %v1178_v34 = vpack.c.bf16 %v3427_v61, %v3427_v61 }
 0xbb1   :  { %1180 = vrot.lane.b32.xlu0 %v1178_v34, %s3083_s0  ;;  %v2279_v34 = vunpack.c.h.bf16 %v2287_v60 }
 0xc23   :  { %v1181_v62 = vpop.permute.xlu0 %1180 }
 0xc24   :  { %2726 = vmatmul.mubr.msk.bf16.vlgmr.msra.gmra.mxu0 %vm124_vm1, %v1181_v62  ;;  %2762 = vmatmul.mubr.msk.bf16.vlgmr.msra.gmra.mxu1 %vm124_vm1, %v1181_v62 }
 0xc25   :  { %2733 = vmatprep.mubr.msk.bf16.mxu0 %vm3082_vm0, %v3081_v0  ;;  %2766 = vmatpush3.bf16.msra.mxu1 %v3173_v36 }
 0xc26   :  { %2767 = vmatprep.subr.bf16.mxu1 %v3081_v0  ;;  %2781 = vmatprep.mubr.msk.bf16.mxu1 %vm3082_vm0, %v3081_v0 }
 0xc29   :  { %2768 = vmatpush3.bf16.msra.mxu1 %v3179_v37 }
 0xc2a   :  { %2769 = vmatprep.subr.bf16.mxu1 %v3081_v0 }
 0xc2d   :  { %2770 = vmatpush3.bf16.msra.mxu1 %v3185_v38 }
 0xc2e   :  { %2771 = vmatprep.subr.bf16.mxu1 %v3081_v0 }
 0xc31   :  { %2772 = vmatpush3.bf16.msra.mxu1 %v3189_v39 }
 0xc32   :  { %2773 = vmatprep.subr.bf16.mxu1 %v3081_v0 }
 0xc35   :  { %2774 = vmatpush3.bf16.msra.mxu1 %v3193_v40 }
 0xc36   :  { %2775 = vmatprep.subr.bf16.mxu1 %v3081_v0 }
 0xc39   :  { %2776 = vmatpush3.bf16.msra.mxu1 %v3197_v41 }
 0xc3a   :  { %2777 = vmatprep.subr.bf16.mxu1 %v3081_v0 }
 0xc3d   :  { %2778 = vmatpush3.bf16.msra.mxu1 %v3201_v42 }
 0xc3e   :  { %2779 = vmatprep.subr.bf16.mxu1 %v3081_v0 }
 0xc41   :  { %2780 = vmatpush3.bf16.msra.mxu1 %v3205_v43 }
 0xc42   :  { %2805 = vmatprep.subr.bf16.mxu1 %v3081_v0 }
 0xce4   :  { %v1231_v1 = vpop.f32.mrf.mxu0  ;;  %v3457_v2 = vpop.f32.mrf.mxu1 }
 0xce5   :  { %v1232_v12 = vadd.f32 %v2274_v63, %v1231_v1 }
 0xce6   :  { %v2727_v5 = vpop.f32.mrf.mxu0  ;;  %v2763_v6 = vpop.f32.mrf.mxu1 }
 0xce7   :  { %3008 = vtanh.f32 %v1232_v12 }
 0xce8   :  { %v1234_v7 = vpop.f32.mrf.mxu0  ;;  %v1422_v8 = vpop.f32.mrf.mxu1 }
 0xcea   :  { %v2728_v9 = vpop.f32.mrf.mxu0  ;;  %v2764_v10 = vpop.f32.mrf.mxu1 }
 0xceb   :  { %v1177_v9 = vunpack.c.h.bf16 %v3416_v15  ;;  %v2970_v15 = vld [vmem:[#allocation2 + $0x208] sm:$0xff]  }
 0xcf4   :  { %v3009_v11 = vpop.eup %3008 }
 0xcf5   :  { %v1240_v13 = vmul.f32 %v3009_v11, %v3148_v21  ;;  %v1241_v14 = vmul.f32 %v3009_v11, %v3150_v22  ;;  %v1238_v17 = vmul.f32 %v3009_v11, %v3152_v23  ;;  %v1239_v18 = vmul.f32 %v3009_v11, %v3154_v24  ;;  %v2961_v21 = vld [vmem:[#allocation2 + $0x130] sm:$0xff]   ;;  %v2962_v22 = vld [vmem:[#allocation2 + $0x128] sm:$0xff]   ;;  %v2963_v23 = vld [vmem:[#allocation2 + $0x120] sm:$0xff]  }
 0xcf6   :  { %v2964_v24 = vld [vmem:[#allocation2 + $0x118] sm:$0xff]   ;;  %v2278_v11 = vunpack.c.l.bf16 %v2287_v60 }
 0xcf7   :  { %v1243_v16 = vpack.c.bf16 %v1241_v14, %v1240_v13  ;;  %v1242_v19 = vpack.c.bf16 %v1239_v18, %v1238_v17 }
 0xcf9   :  { %2730 = vmatpush3.bf16.msra.mxu0 %v1243_v16 }
 0xcfa   :  { %2731 = vmatprep.subr.bf16.mxu0 %v3081_v0 }
 0xcfd   :  { %2732 = vmatpush3.bf16.msra.mxu0 %v1242_v19 }
 0xcfe   :  { %2737 = vmatprep.subr.bf16.mxu0 %v3081_v0 }
 0xd00   :  { %2734 = vmatmul.mubr.msk.bf16.vlgmr.msra.gmra.mxu0 %vm124_vm1, %v3164_v32  ;;  %v2965_v32 = vld [vmem:[#allocation2 + $0x110] sm:$0xff]  }
 0xd01   :  { %2738 = vmatpush3.bf16.msra.mxu0 %v2960_v20  ;;  %2753 = vmatprep.mubr.msk.bf16.mxu0 %vm3082_vm0, %v3081_v0  ;;  %v2969_v20 = vld [vmem:[#allocation2 + $0x210] sm:$0xff]  }
 0xd02   :  { %2739 = vmatprep.subr.bf16.mxu0 %v3081_v0 }
 0xd05   :  { %2740 = vmatpush3.bf16.msra.mxu0 %v2961_v21 }
 0xd06   :  { %2741 = vmatprep.subr.bf16.mxu0 %v3081_v0 }
 0xd09   :  { %2742 = vmatpush3.bf16.msra.mxu0 %v2962_v22 }
 0xd0a   :  { %2743 = vmatprep.subr.bf16.mxu0 %v3081_v0 }
 0xd0d   :  { %2744 = vmatpush3.bf16.msra.mxu0 %v2963_v23 }
 0xd0e   :  { %2745 = vmatprep.subr.bf16.mxu0 %v3081_v0 }
 0xd11   :  { %2746 = vmatpush3.bf16.msra.mxu0 %v2964_v24  ;;  %v2971_v24 = vld [vmem:[#allocation2 + $0x200] sm:$0xff]  }
 0xd12   :  { %2747 = vmatprep.subr.bf16.mxu0 %v3081_v0 }
 0xd15   :  { %2748 = vmatpush3.bf16.msra.mxu0 %v2965_v32  ;;  %v1666_v32 = vld [vmem:[%s3598_s2] sm:$0x3]  ;;  %s3086_s2 = smov [#allocation5]  }
 0xd16   :  { %2749 = vmatprep.subr.bf16.mxu0 %v3081_v0  ;;  %s2151_s27 = sshll.u32 %s3086_s2, 4  ;;  %s2152_s27 = int_to_ptr.vmem [resolvable:$true] %s2151_s27 }
 0xd17   :  { %s3054_s28 = scalar_lea.vmem %s2152_s27, 16  ;;  %s3058_s29 = scalar_lea.vmem %s2152_s27, 32 }
 0xd18   :  { %p3055_p5 = scmp.ne.s32.totalorder %s2152_s27, %s3054_s28  ;;  %p3059_p6 = scmp.lt.s32.totalorder %s2152_s27, %s2152_s27 }
 0xd19   :  { %2750 = vmatpush3.bf16.msra.mxu0 %v2966_v3  ;;  %v1667_v3 = vpack.c.bf16 %v1666_v32, %v1666_v32  ;;  %p3060_p7 = scmp.lt.s32.totalorder %s3058_s29, %s3054_s28 }
 0xd1a   :  { %2751 = vmatprep.subr.bf16.mxu0 %v3081_v0 }
 0xd1b   :  { %p3061_p8 = por %p3060_p7, %p3059_p6 }
 0xd1d   :  { %2752 = vmatpush3.bf16.msra.mxu0 %v2967_v26  ;;  %p3062_p9 = pnand %p3061_p8, %p3055_p5 }
 0xd1e   :  { %2785 = vmatprep.subr.bf16.mxu0 %v3081_v0 }
 0xdc0   :  { %v1278_v27 = vpop.f32.mrf.mxu0 }
 0xdc1   :  { %v1284_v29 = vpack.c.bf16 %v1278_v27, %v1278_v27 }
 0xdc2   :  { %v2735_v30 = vpop.f32.mrf.mxu0 }
 0xdc3   :  { %2754 = vmatmul.mubr.bf16.vlgmr.msra.gmra.mxu0 %v1284_v29  ;;  %v2972_v29 = vld [vmem:[#allocation2 + $0x258] sm:$0xff]   ;;  %v2976_v30 = vld [vmem:[#allocation2 + $0x248] sm:$0xff]  }
 0xdc4   :  { %v1281_v31 = vpop.f32.mrf.mxu0  ;;  %2786 = vmatpush3.bf16.msra.mxu0 %v3214_v53  ;;  %2801 = vmatprep.mubr.msk.bf16.mxu0 %vm3082_vm0, %v3081_v0 }
 0xdc5   :  { %2787 = vmatprep.subr.bf16.mxu0 %v3081_v0  ;;  %v2973_v31 = vld [vmem:[#allocation2 + $0x250] sm:$0xff]  }
 0xdc6   :  { %v2736_v33 = vpop.f32.mrf.mxu0 }
 0xdc7   :  { %v2977_v33 = vld [vmem:[#allocation2 + $0x240] sm:$0xff]  }
 0xdc8   :  { %2788 = vmatpush3.bf16.msra.mxu0 %v3217_v54 }
 0xdc9   :  { %2789 = vmatprep.subr.bf16.mxu0 %v3081_v0 }
 0xdcc   :  { %2790 = vmatpush3.bf16.msra.mxu0 %v3221_v55 }
 0xdcd   :  { %2791 = vmatprep.subr.bf16.mxu0 %v3081_v0 }
 0xdd0   :  { %2792 = vmatpush3.bf16.msra.mxu0 %v3225_v56 }
 0xdd1   :  { %2793 = vmatprep.subr.bf16.mxu0 %v3081_v0 }
 0xdd4   :  { %2794 = vmatpush3.bf16.msra.mxu0 %v3229_v57 }
 0xdd5   :  { %2795 = vmatprep.subr.bf16.mxu0 %v3081_v0 }
 0xdd8   :  { %2796 = vmatpush3.bf16.msra.mxu0 %v3233_v58 }
 0xdd9   :  { %2797 = vmatprep.subr.bf16.mxu0 %v3081_v0 }
 0xddc   :  { %2798 = vmatpush3.bf16.msra.mxu0 %v3237_v59 }
 0xddd   :  { %2799 = vmatprep.subr.bf16.mxu0 %v3081_v0 }
 0xde0   :  { %2800 = vmatpush3.bf16.msra.mxu0 %v3264_v4 }
 0xde1   :  { %2825 = vmatprep.subr.bf16.mxu0 %v3081_v0 }
 0xe83   :  { %v1367_v35 = vpop.f32.mrf.mxu0 }
 0xe84   :  { %v1425_v44 = vpack.c.bf16 %v1367_v35, %v1367_v35 }
 0xe85   :  { %v2755_v45 = vpop.f32.mrf.mxu0 }
 0xe86   :  { %2782 = vmatmul.mubr.bf16.vlgmr.msra.gmra.mxu1 %v1425_v44  ;;  %v1668_v44 = vlaneseq }
 0xe87   :  { %2806 = vmatpush3.bf16.msra.mxu1 %v3173_v36  ;;  %v1370_v47 = vpop.f32.mrf.mxu0  ;;  %2821 = vmatprep.mubr.msk.bf16.mxu1 %vm3082_vm0, %v3081_v0  ;;  %v1513_v36 = vpack.c.bf16 %v3457_v2, %v3457_v2 }
 0xe88   :  { %2807 = vmatprep.subr.bf16.mxu1 %v3081_v0  ;;  %v1669_v45 = vshrl.u32 %v1668_v44, 7  ;;  %v3558_v47 = vld [vmem:[#allocation2 + $0x280] sm:$0x1] }
 0xe89   :  { %v2756_v46 = vpop.f32.mrf.mxu0  ;;  %v2979_v44 = vld [vmem:[#allocation2 + $0x220] sm:$0xff]  }
 0xe8a   :  { %v1660_v46 = vunpack.c.l.bf16 %v3558_v47  ;;  %v1661_v47 = vld [vmem:[#allocation2 + $0x280] sm:$0x2] }
 0xe8b   :  { %2808 = vmatpush3.bf16.msra.mxu1 %v3179_v37 }
 0xe8c   :  { %2809 = vmatprep.subr.bf16.mxu1 %v3081_v0 }
 0xe8f   :  { %2810 = vmatpush3.bf16.msra.mxu1 %v3185_v38 }
 0xe90   :  { %2811 = vmatprep.subr.bf16.mxu1 %v3081_v0 }
 0xe93   :  { %2812 = vmatpush3.bf16.msra.mxu1 %v3189_v39 }
 0xe94   :  { %2813 = vmatprep.subr.bf16.mxu1 %v3081_v0 }
 0xe97   :  { %2814 = vmatpush3.bf16.msra.mxu1 %v3193_v40 }
 0xe98   :  { %2815 = vmatprep.subr.bf16.mxu1 %v3081_v0 }
 0xe9b   :  { %2816 = vmatpush3.bf16.msra.mxu1 %v3197_v41 }
 0xe9c   :  { %2817 = vmatprep.subr.bf16.mxu1 %v3081_v0 }
 0xe9f   :  { %2818 = vmatpush3.bf16.msra.mxu1 %v3201_v42 }
 0xea0   :  { %2819 = vmatprep.subr.bf16.mxu1 %v3081_v0 }
 0xea3   :  { %2820 = vmatpush3.bf16.msra.mxu1 %v3205_v43 }
 0xea4   :  { %2845 = vmatprep.subr.bf16.mxu1 %v3081_v0 }
 0xea6   :  { %2822 = vmatmul.mubr.bf16.vlgmr.msra.gmra.mxu1 %v1513_v36  ;;  %v1670_v36 = vsub.s32 0, %v1669_v45 }
 0xea7   :  { %2853 = vmatprep.mubr.msk.bf16.mxu1 %vm3082_vm0, %v3081_v0 }
 0xf46   :  { %v1460_v37 = vpop.f32.mrf.mxu1 }
 0xf47   :  { %v1466_v38 = vsub.f32 %v1367_v35, %v1460_v37  ;;  %v1671_v37 = vrot.slane %v1660_v46, %v1670_v36 }
 0xf48   :  { %v2783_v39 = vpop.f32.mrf.mxu1 }
 0xf49   :  { %v1467_v40 = vmul.f32 %v1466_v38, %v1466_v38 }
 0xf4a   :  { %v1463_v41 = vpop.f32.mrf.mxu1 }
 0xf4b   :  { %v1468_v48 = vpack.c.bf16 %v1467_v40, %v1467_v40 }
 0xf4c   :  { %v2784_v42 = vpop.f32.mrf.mxu1 }
 0xf4d   :  { %2802 = vmatmul.mubr.bf16.vlgmr.msra.gmra.mxu0 %v1468_v48 }
 0xf4e   :  { %2826 = vmatpush3.bf16.msra.mxu0 %v3214_v53  ;;  %2841 = vmatprep.mubr.msk.bf16.mxu0 %vm3082_vm0, %v3081_v0 }
 0xf4f   :  { %2827 = vmatprep.subr.bf16.mxu0 %v3081_v0 }
 0xf52   :  { %2828 = vmatpush3.bf16.msra.mxu0 %v3217_v54 }
 0xf53   :  { %2829 = vmatprep.subr.bf16.mxu0 %v3081_v0 }
 0xf56   :  { %2830 = vmatpush3.bf16.msra.mxu0 %v3221_v55 }
 0xf57   :  { %2831 = vmatprep.subr.bf16.mxu0 %v3081_v0 }
 0xf5a   :  { %2832 = vmatpush3.bf16.msra.mxu0 %v3225_v56 }
 0xf5b   :  { %2833 = vmatprep.subr.bf16.mxu0 %v3081_v0 }
 0xf5e   :  { %2834 = vmatpush3.bf16.msra.mxu0 %v3229_v57 }
 0xf5f   :  { %2835 = vmatprep.subr.bf16.mxu0 %v3081_v0 }
 0xf62   :  { %2836 = vmatpush3.bf16.msra.mxu0 %v3233_v58 }
 0xf63   :  { %2837 = vmatprep.subr.bf16.mxu0 %v3081_v0 }
 0xf66   :  { %v1548_v43 = vpop.f32.mrf.mxu1  ;;  %2838 = vmatpush3.bf16.msra.mxu0 %v3237_v59 }
 0xf67   :  { %v1554_v53 = vsub.f32 %v3457_v2, %v1548_v43  ;;  %2839 = vmatprep.subr.bf16.mxu0 %v3081_v0 }
 0xf68   :  { %v2823_v54 = vpop.f32.mrf.mxu1 }
 0xf69   :  { %v1555_v55 = vmul.f32 %v1554_v53, %v1554_v53 }
 0xf6a   :  { %v1551_v56 = vpop.f32.mrf.mxu1  ;;  %2840 = vmatpush3.bf16.msra.mxu0 %v3264_v4  ;;  %v2275_v4 = vunpack.c.h.bf16 %v3454_v28 }
 0xf6b   :  { %v1556_v49 = vpack.c.bf16 %v1555_v55, %v1555_v55  ;;  %2865 = vmatprep.subr.bf16.mxu0 %v3081_v0  ;;  %v2975_v55 = vld [vmem:[#allocation2 + $0x230] sm:$0xff]  }
 0xf6c   :  { %v2824_v57 = vpop.f32.mrf.mxu1 }
 0xf6d   :  { %2842 = vmatmul.mubr.bf16.vlgmr.msra.gmra.mxu0 %v1556_v49 }
 0xf6e   :  { %2869 = vmatprep.mubr.msk.bf16.mxu0 %vm3082_vm0, %v3081_v0  ;;  %2866 = vmatpush3.bf16.msra.mxu0 %v2976_v30 }
 0xf6f   :  { %2867 = vmatprep.subr.bf16.mxu0 %v3081_v0 }
 0xf72   :  { %2868 = vmatpush3.bf16.msra.mxu0 %v2977_v33 }
 0xf73   :  { %2881 = vmatprep.subr.bf16.mxu0 %v3081_v0 }
0x100d   :  { %v1503_v58 = vpop.f32.mrf.mxu0 }
0x100e   :  { %v1504_v59 = vadd.f32 %v1503_v58, %v3289_v25 }
0x100f   :  { %v2803_v50 = vpop.f32.mrf.mxu0 }
0x1010   :  { %3010 = vrsqrt.f32 %v1504_v59 }
0x1011   :  { %v1506_v51 = vpop.f32.mrf.mxu0 }
0x1013   :  { %v2804_v52 = vpop.f32.mrf.mxu0 }
0x101d   :  { %v3011_v62 = vpop.eup %3010 }
0x101e   :  { %v1510_v63 = vmul.f32 %v3011_v62, %v2279_v34 }
0x1020   :  { %v1511_v1 = vmul.f32 %v1510_v63, %v1466_v38 }
0x1022   :  { %v1512_v2 = vadd.f32 %v2275_v4, %v1511_v1 }
0x102d   :  { %v1591_v12 = vpop.f32.mrf.mxu0 }
0x102e   :  { %v1592_v5 = vadd.f32 %v1591_v12, %v3289_v25  ;;  %v2968_v25 = vld [vmem:[#allocation2 + $0x218] sm:$0xff]   ;;  %v1663_v12 = vld [vmem:[#allocation2 + $0x280] sm:$0x4] }
0x102f   :  { %v2843_v6 = vpop.f32.mrf.mxu0  ;;  %2846 = vmatpush3.bf16.msra.mxu1 %v2968_v25 }
0x1030   :  { %3012 = vrsqrt.f32 %v1592_v5  ;;  %2847 = vmatprep.subr.bf16.mxu1 %v3081_v0  ;;  %v1664_v5 = vunpack.c.l.bf16 %v1663_v12  ;;  %v1864_v6 = vsub.s32 4, %v1669_v45 }
0x1031   :  { %v1594_v7 = vpop.f32.mrf.mxu0 }
0x1033   :  { %v2844_v8 = vpop.f32.mrf.mxu0  ;;  %2848 = vmatpush3.bf16.msra.mxu1 %v2969_v20 }
0x1034   :  { %2849 = vmatprep.subr.bf16.mxu1 %v3081_v0  ;;  %v1865_v8 = vrot.slane %v1664_v5, %v1864_v6 }
0x1037   :  { %2850 = vmatpush3.bf16.msra.mxu1 %v2970_v15 }
0x1038   :  { %2851 = vmatprep.subr.bf16.mxu1 %v3081_v0 }
0x103b   :  { %2852 = vmatpush3.bf16.msra.mxu1 %v2971_v24 }
0x103c   :  { %2857 = vmatprep.subr.bf16.mxu1 %v3081_v0 }
0x103d   :  { %v3013_v10 = vpop.eup %3012 }
0x103e   :  { %v1598_v13 = vmul.f32 %v3013_v10, %v1177_v9  ;;  %2854 = vmatmul.mubr.msk.bf16.vlgmr.msra.gmra.mxu1 %vm1696_vm2, %v1667_v3 }
0x103f   :  { %2861 = vmatprep.mubr.msk.bf16.mxu1 %vm3082_vm0, %v3081_v0  ;;  %2858 = vmatpush3.bf16.msra.mxu1 %v2972_v29 }
0x1040   :  { %v1599_v14 = vmul.f32 %v1598_v13, %v1554_v53  ;;  %2859 = vmatprep.subr.bf16.mxu1 %v3081_v0  ;;  %v2974_v53 = vld [vmem:[#allocation2 + $0x238] sm:$0xff]  }
0x1042   :  { %v1600_v16 = vadd.f32 %v2278_v11, %v1599_v14 }
0x1043   :  { %2860 = vmatpush3.bf16.msra.mxu1 %v2973_v31 }
0x1044   :  { %1609 = vrot.lane.b32.xlu1 %v1600_v16, %s3079_s18  ;;  %v1601_v28 = vadd.f32 %v1600_v16, %v1512_v2  ;;  %2873 = vmatprep.subr.bf16.mxu1 %v3081_v0 }
0x1046   :  { %v2223_v17 = vmul.f32 -1.442695, %v1601_v28 }
0x1048   :  { %3014 = vpow2.f32 %v2223_v17 }
0x1055   :  { %v3015_v18 = vpop.eup %3014 }
0x1056   :  { %v1605_v19 = vadd.f32 1.0, %v3015_v18 }
0x1058   :  { %3016 = vrcp.f32 %v1605_v19 }
0x1065   :  { %v3017_v21 = vpop.eup %3016 }
0x1066   :  { %v1619_v56 = vsub.f32 1.0, %v3017_v21  ;;  %v1625_v57 = vmul.f32 %v3017_v21, %v3427_v61 }
0x10b6   :  { %v1610_v22 = vpop.permute.xlu1 %1609 }
0x10b7   :  { %v1612_v23 = vmul.f32 %v3017_v21, %v1610_v22 }
0x10b9   :  { %1614 = vrot.lane.b32.xlu0 %v1612_v23, %s3079_s18 }
0x10fe   :  { %v1734_v38 = vpop.f32.mrf.mxu1 }
0x10ff   :  { %v1735_v39 = vadd.f32 %v1734_v38, %v1671_v37 }
0x1100   :  { %v2855_v40 = vpop.f32.mrf.mxu1 }
0x1102   :  { %v1737_v41 = vpop.f32.mrf.mxu1 }
0x1104   :  { %v2856_v48 = vpop.f32.mrf.mxu1 }
0x112b   :  { %v1615_v26 = vpop.permute.xlu0 %1614 }
0x112c   :  { %v1617_v27 = vadd.f32 %v1615_v26, %v1512_v2  ;;  %v3085_v2 = vmov 0  }
0x112d   :  { %2914 = vset.pattern.permute.xlu1 %v3085_v2  ;;  %2915 = vset.pattern.permute.xlu0 %v3085_v2 }
0x112e   :  { %3018 = vtanh.f32 %v1617_v27 }
0x112f   :  { %3020 = vtanh.f32 %v1735_v39 }
0x113b   :  { %v3019_v35 = vpop.eup %3018 }
0x113c   :  { %1621 = vrot.lane.b32.xlu1 %v3019_v35, %s3083_s0  ;;  %v3021_v42 = vpop.eup %3020  ;;  %v2978_v35 = vld [vmem:[#allocation2 + $0x228] sm:$0xff]  }
0x113d   :  { %v1741_v43 = vpack.c.bf16 %v3021_v42, %v3021_v42 }
0x113f   :  { %v1743_v54 = vshrl.u32 %v1741_v43, 16 }
0x1141   :  { %2862 = vmatmul.mubr.msk.bf16.vlgmr.msra.gmra.mxu1 %vm124_vm1, %v1743_v54  ;;  %v2980_v54 = vld [vmem:[#allocation2 + $0x268] sm:$0xff]  }
0x1142   :  { %2874 = vmatpush3.bf16.msra.mxu1 %v2974_v53  ;;  %2877 = vmatprep.mubr.msk.bf16.mxu1 %vm3082_vm0, %v3081_v0 }
0x1143   :  { %2875 = vmatprep.subr.bf16.mxu1 %v3081_v0 }
0x1146   :  { %2876 = vmatpush3.bf16.msra.mxu1 %v2975_v55  ;;  %v2981_v55 = vld [vmem:[#allocation2 + $0x260] sm:$0xff]  }
0x1147   :  { %2889 = vmatprep.subr.bf16.mxu1 %v3081_v0 }
0x1149   :  { %2878 = vmatmul.mubr.msk.bf16.vlgmr.msra.gmra.mxu1 %vm124_vm1, %v1741_v43 }
0x114a   :  { %2893 = vmatprep.mubr.msk.bf16.mxu1 %vm3082_vm0, %v3081_v0  ;;  %2890 = vmatpush3.bf16.msra.mxu1 %v2980_v54 }
0x114b   :  { %2891 = vmatprep.subr.bf16.mxu1 %v3081_v0 }
0x114e   :  { %2892 = vmatpush3.bf16.msra.mxu1 %v2981_v55 }
0x11ae   :  { %v1622_v49 = vpop.permute.xlu1 %1621 }
0x11af   :  { %v1624_v58 = vmul.f32 %v1622_v49, %v1619_v56  ;;  %v2015_v56 = vrot.slane %v1660_v46, 1  ;;  %v1662_v46 = vunpack.c.l.bf16 %v1661_v47 }
0x11b1   :  { %v1626_v59 = vadd.f32 %v1625_v57, %v1624_v58 }
0x11b3   :  { %v1665_v50 = vpack.c.bf16 %v1626_v59, %v1626_v59 }
0x11b5   :  { %1805 = vrot.lane.b32.xlu0 %v1665_v50, %s3083_s0 }
0x1201   :  { %v1794_v52 = vpop.f32.mrf.mxu1 }
0x1202   :  { %v1803_v7 = vrot.slane %v1794_v52, %v1670_v36 }
0x1203   :  { %v2863_v60 = vpop.f32.mrf.mxu1 }
0x1205   :  { %v1797_v34 = vpop.f32.mrf.mxu1 }
0x1206   :  { %v2982_v34 = vld [vmem:[#allocation2 + $0x278] sm:$0xff]  }
0x1207   :  { %v2864_v62 = vpop.f32.mrf.mxu1 }
0x1208   :  { %v2983_v62 = vld [vmem:[#allocation2 + $0x270] sm:$0xff]  }
0x1209   :  { %v3576_v4 = vpop.f32.mrf.mxu1 }
0x120b   :  { %v2879_v63 = vpop.f32.mrf.mxu1 }
0x120c   :  { %v2033_v63 = vrot.slane %v1662_v46, 2 }
0x120d   :  { %v1953_v1 = vpop.f32.mrf.mxu1 }
0x120f   :  { %v2880_v61 = vpop.f32.mrf.mxu1 }
0x1227   :  { %v1806_v51 = vpop.permute.xlu0 %1805 }
0x1228   :  { %2870 = vmatmul.mubr.msk.bf16.vlgmr.msra.gmra.mxu0 %vm124_vm1, %v1806_v51 }
0x1229   :  { %2885 = vmatprep.mubr.msk.bf16.mxu0 %vm3082_vm0, %v3081_v0  ;;  %2882 = vmatpush3.bf16.msra.mxu0 %v2978_v35 }
0x122a   :  { %2883 = vmatprep.subr.bf16.mxu0 %v3081_v0 }
0x122d   :  { %2884 = vmatpush3.bf16.msra.mxu0 %v2979_v44 }
0x122e   :  { %2897 = vmatprep.subr.bf16.mxu0 %v3081_v0 }
0x12e8   :  { %v1856_v9 = vpop.f32.mrf.mxu0 }
0x12e9   :  { %v1857_v10 = vadd.f32 %v1856_v9, %v1803_v7  ;;  %v2092_v7 = vrot.slane %v1662_v46, 3 }
0x12ea   :  { %v2871_v11 = vpop.f32.mrf.mxu0 }
0x12eb   :  { %v1866_v13 = vadd.f32 %v1865_v8, %v1857_v10 }
0x12ec   :  { %v1859_v14 = vpop.f32.mrf.mxu0 }
0x12ed   :  { %v1868_v16 = vsel %vm1867_vm3, %v1866_v13, -inf }
0x12ee   :  { %v1869_v28 = vrot.slane %v1868_v16, 4  ;;  %v2872_v17 = vpop.f32.mrf.mxu0 }
0x12f0   :  { %v1870_v18 = vmax.f32 %v1868_v16, %v1869_v28 }
0x12f2   :  { %v1871_v19 = vrot.slane %v1870_v18, 2 }
0x12f4   :  { %v1872_v25 = vmax.f32 %v1870_v18, %v1871_v19 }
0x12f6   :  { %v1873_v20 = vrot.slane %v1872_v25, 1 }
0x12f8   :  { %v1874_v15 = vmax.f32 %v1872_v25, %v1873_v20 }
0x12fa   :  { %v1875_v21 = vsub.f32 %v1866_v13, %v1874_v15 }
0x12fc   :  { %v1876_v22 = vmul.f32 1.442695, %v1875_v21 }
0x12fe   :  { %3022 = vpow2.f32 %v1876_v22 }
0x130b   :  { %v3023_v23 = vpop.eup %3022 }
0x130c   :  { %v1878_v24 = vsel %vm1867_vm3, %v3023_v23, 0.0 }
0x130d   :  { %v1879_v32 = vrot.slane %v1878_v24, 4 }
0x130f   :  { %v1880_v3 = vadd.f32 %v1879_v32, %v1878_v24 }
0x1311   :  { %v1881_v26 = vrot.slane %v1880_v3, 2 }
0x1313   :  { %v1882_v27 = vadd.f32 %v1881_v26, %v1880_v3 }
0x1315   :  { %v1883_v29 = vrot.slane %v1882_v27, 1 }
0x1317   :  { %v1884_v30 = vadd.f32 %v1883_v29, %v1882_v27 }
0x1319   :  { %3024 = vrcp.f32 %v1884_v30 }
0x1326   :  { %v3025_v31 = vpop.eup %3024 }
0x1327   :  { %v1886_v33 = vmul.f32 %v3025_v31, %v3023_v23 }
0x1329   :  { %1889 = vperm.xlu1 %2914, %v1886_v33  }
0x13a4   :  { %v1890_v45 = vpop.permute.xlu1 %1889 }
0x13a5   :  { %v1892_v36 = vmul.f32 %v1890_v45, %v1626_v59 }
0x13a7   :  { %v1894_v37 = vsel %vm1893_vm4, %v1892_v36, 0.0 }
0x13a8   :  { %v1895_v38 = vrot.slane %v1894_v37, 4 }
0x13aa   :  { %v1896_v39 = vadd.f32 %v1895_v38, %v1894_v37 }
0x13ac   :  { %v1897_v40 = vrot.slane %v1896_v39, 2 }
0x13ae   :  { %v1898_v41 = vadd.f32 %v1897_v40, %v1896_v39 }
0x13b0   :  { %v1899_v48 = vrot.slane %v1898_v41, 1 }
0x13b2   :  { %v1900_v42 = vadd.f32 %v1899_v48, %v1898_v41 }
0x13b4   :  { %v1901_v43 = vpack.c.bf16 %v1900_v42, %v1900_v42 }
0x13b6   :  { %1957 = vrot.lane.b32.xlu0 %v1901_v43, %s3083_s0 }
0x1428   :  { %v1958_v53 = vpop.permute.xlu0 %1957 }
0x1429   :  { %2886 = vmatmul.mubr.msk.bf16.vlgmr.msra.gmra.mxu0 %vm124_vm1, %v1958_v53 }
0x142a   :  { %2901 = vmatprep.mubr.msk.bf16.mxu0 %vm3082_vm0, %v3081_v0  ;;  %2898 = vmatpush3.bf16.msra.mxu0 %v2982_v34 }
0x142b   :  { %2899 = vmatprep.subr.bf16.mxu0 %v3081_v0 }
0x142e   :  { %2900 = vmatpush3.bf16.msra.mxu0 %v2983_v62 }
0x14e9   :  { %v2008_v49 = vpop.f32.mrf.mxu0 }
0x14ea   :  { %v2009_v57 = vadd.f32 %v2008_v49, %v3576_v4 }
0x14eb   :  { %v2887_v58 = vpop.f32.mrf.mxu0 }
0x14ec   :  { %v2017_v59 = vadd.f32 %v2015_v56, %v2009_v57 }
0x14ed   :  { %v2011_v50 = vpop.f32.mrf.mxu0 }
0x14ee   :  { %3026 = vtanh.f32 %v2017_v59 }
0x14ef   :  { %v2888_v51 = vpop.f32.mrf.mxu0 }
0x14fb   :  { %v3027_v52 = vpop.eup %3026 }
0x14fc   :  { %v2019_v60 = vpack.c.bf16 %v3027_v52, %v3027_v52 }
0x14fe   :  { %2894 = vmatmul.mubr.msk.bf16.vlgmr.msra.gmra.mxu1 %vm124_vm1, %v2019_v60 }
0x15be   :  { %v2072_v1 = vpop.f32.mrf.mxu1 }
0x15bf   :  { %v2073_v4 = vadd.f32 %v2072_v1, %v2033_v63 }
0x15c0   :  { %v2895_v61 = vpop.f32.mrf.mxu1 }
0x15c1   :  { %3028 = vtanh.f32 %v2073_v4 }
0x15c2   :  { %v2075_v2 = vpop.f32.mrf.mxu1 }
0x15c4   :  { %v2896_v12 = vpop.f32.mrf.mxu1 }
0x15ce   :  { %v3029_v5 = vpop.eup %3028 }
0x15cf   :  { %v2079_v6 = vpack.c.bf16 %v3029_v5, %v3029_v5 }
0x15d1   :  { %2902 = vmatmul.mubr.msk.bf16.vlgmr.msra.gmra.mxu0 %vm124_vm1, %v2079_v6 }
0x1691   :  { %v2131_v8 = vpop.f32.mrf.mxu0 }
0x1692   :  { %v2132_v9 = vadd.f32 %v2131_v8, %v2092_v7 }
0x1693   :  { %v2903_v10 = vpop.f32.mrf.mxu0 }
0x1694   :  { %v2247_v0 = vmul.f32 -1.442695, %v2132_v9 }
0x1695   :  { %v2134_v11 = vpop.f32.mrf.mxu0 }
0x1696   :  { %3030 = vpow2.f32 %v2247_v0 }
0x1697   :  { %v2904_v13 = vpop.f32.mrf.mxu0 }
0x16a3   :  { %v3031_v14 = vpop.eup %3030 }
0x16a4   :  { %v2140_v16 = vadd.f32 1.0, %v3031_v14 }
0x16a6   :  { %3032 = vrcp.f32 %v2140_v16 }
0x16b3   :  { %v3033_v28 = vpop.eup %3032 }
0x16b4   :  { %2144 = vst.msk [vmem:[#allocation5] sm:$0x1] %vm2143_vm5, %v3033_v28 }
0x16b5   :  { %3065 = shalt.err (!%p3062_p9)
}
0x16b6   :  { %2154 = dma.vmem_to_hbm [thread:$0]  %s2152_s27, 16, %s3600_s4, [#allocation4]  }
0x16b7   :  { %3076 = dma.done.wait [#allocation4], 16  }
0x16b8   :  { %3077 = vsyncadd [#allocation4], 4294967280 }
0x16b9   :  { %2158 = vsyncpa [#allocation3], 1 }
0x16ba   :  { %2159 = vsyncpa [#allocation4], 1 }

</bundles_post_ra>
